<compile_context>
chip_gen: v7x
topology: tpu7x:2x2x1
jax: 0.10.0
libtpu: 0.0.40
codegen_flags: <defaults>
</compile_context>

<pallas_src>
import functools

import jax
import jax.numpy as jnp
from jax.experimental import pallas as pl
from jax.experimental.pallas import tpu as pltpu


# ----------------------------------------------------------------------------
# Model config
# ----------------------------------------------------------------------------
VOCAB = 100
MAX_POS = 32
HIDDEN = 32
N_HEADS = 2
HEAD_DIM = HIDDEN // N_HEADS
N_LAYERS = 2
INTERMEDIATE = 64
NUM_LABELS = 3
NUM_LABELS_PAD = 128      # lane-dense head output; real logits are [:, :NUM_LABELS]
LN_EPS = 1e-12

# v5e / v6e (1 TensorCore): 1 grid step.  v7x (2 TensorCores): set to 2 so the
# "parallel" grid axis gives each core one fat batch block (B % 2 == 0).
NUM_BATCH_BLOCKS = 1


# ----------------------------------------------------------------------------
# Parameter slab layout (all parameters packed into one (SLAB_ROWS, 128) f32
# array; static row/lane windows are sliced out inside the kernel).
# ----------------------------------------------------------------------------
def _round_up(x, m):
    return (x + m - 1) // m * m


def _param_entry_shapes():
    shapes = {
        "emb_ln_g": (1, HIDDEN),
        "emb_ln_b": (1, HIDDEN),
        "head_b": (1, NUM_LABELS_PAD),
        "head_w": (HIDDEN, NUM_LABELS_PAD),
        "pos_type_emb": (MAX_POS, HIDDEN),
        "word_emb": (VOCAB, HIDDEN),
    }
    for l in range(N_LAYERS):
        shapes[f"wqkv_{l}"] = (HIDDEN, 3 * HIDDEN)
        shapes[f"bqkv_{l}"] = (1, 3 * HIDDEN)
        shapes[f"wo_{l}"] = (HIDDEN, HIDDEN)
        shapes[f"bo_{l}"] = (1, HIDDEN)
        shapes[f"w1_{l}"] = (HIDDEN, INTERMEDIATE)
        shapes[f"b1_{l}"] = (1, INTERMEDIATE)
        shapes[f"w2_{l}"] = (INTERMEDIATE, HIDDEN)
        shapes[f"b2_{l}"] = (1, HIDDEN)
        shapes[f"ln1_g_{l}"] = (1, HIDDEN)
        shapes[f"ln1_b_{l}"] = (1, HIDDEN)
        shapes[f"ln2_g_{l}"] = (1, HIDDEN)
        shapes[f"ln2_b_{l}"] = (1, HIDDEN)
    return shapes


def _build_layout():
    layout = {}
    cursor = 0
    for name, (nr, nc) in _param_entry_shapes().items():
        start = _round_up(cursor, 8) if nr > 1 else cursor   # 8-sublane align matrices
        layout[name] = (start, nr, nc)
        cursor = start + nr
    return layout, _round_up(cursor, 8)


LAYOUT, SLAB_ROWS = _build_layout()


# ----------------------------------------------------------------------------
# Fused encoder + head kernel (single grid step by default)
# ----------------------------------------------------------------------------
def _model_kernel(ids_ref, mask_ref, p_ref, out_ref, ctx_ref, *,
                  layout, bb_size, seq, hidden, n_layers, n_heads, head_dim,
                  vocab, ln_eps):
    f32 = jnp.float32

    def pent(name, nrows=None):
        r0, nr, nc = layout[name]
        nr = nr if nrows is None else nrows
        return p_ref[r0:r0 + nr, 0:nc]

    def mm(a, w):
        return jax.lax.dot_general(
            a, w, dimension_numbers=(((1,), (0,)), ((), ())),
            preferred_element_type=f32)

    def layer_norm(x, g, b):
        mu = jnp.mean(x, axis=-1, keepdims=True)
        var = jnp.mean(jnp.square(x - mu), axis=-1, keepdims=True)
        return (x - mu) * jax.lax.rsqrt(var + ln_eps) * g + b

    def gelu(x):
        # TODO(synk): HF BERT "gelu" is the exact erf form; tanh approximation
        # used here (erf has no guaranteed Mosaic lowering).
        return 0.5 * x * (1.0 + jnp.tanh(
            0.7978845608028654 * (x + 0.044715 * x * x * x)))

    rows = bb_size * seq

    # ---- embedding lookup inside the kernel (one-hot gather on the MXU) ----
    tok = ids_ref[...]                                               # (rows, 1) int32
    onehot = (tok == jax.lax.broadcasted_iota(
        jnp.int32, (rows, vocab), 1)).astype(f32)                    # (rows, VOCAB)
    x = mm(onehot, pent("word_emb"))                                 # (rows, H)
    pos = pent("pos_type_emb", nrows=seq)                            # (S, H), type-0 folded in
    if bb_size > 1:
        pos = jnp.concatenate([pos] * bb_size, axis=0)
    x = layer_norm(x + pos, pent("emb_ln_g"), pent("emb_ln_b"))

    scale = 1.0 / (head_dim ** 0.5)

    for l in range(n_layers):                                        # static unroll
        # ---- fused QKV projection over the whole batch block: (rows, 3H) ----
        qkv = mm(x, pent(f"wqkv_{l}")) + pent(f"bqkv_{l}")

        # ---- attention: loop over batch rows / heads; contexts go to scratch ----
        for b in range(bb_size):
            r0 = b * seq
            add_mask = (1.0 - mask_ref[b]) * (-1e9)                  # (1, S)
            for h in range(n_heads):
                lo = h * head_dim
                hi = lo + head_dim
                qh = qkv[r0:r0 + seq, lo:hi]                         # (S, dH)
                kh = qkv[r0:r0 + seq, hidden + lo:hidden + hi]
                vh = qkv[r0:r0 + seq, 2 * hidden + lo:2 * hidden + hi]
                s = jax.lax.dot_general(                             # q @ k^T
                    qh, kh, dimension_numbers=(((1,), (1,)), ((), ())),
                    preferred_element_type=f32) * scale + add_mask   # (S, S)
                m = jnp.max(s, axis=-1, keepdims=True)
                p = jnp.exp(s - m)
                p = p / jnp.sum(p, axis=-1, keepdims=True)
                ctx_ref[r0:r0 + seq, lo:hi] = mm(p, vh)              # (S, dH)

        # ---- output projection + residual-fused LayerNorm ----
        attn = mm(ctx_ref[...], pent(f"wo_{l}")) + pent(f"bo_{l}")
        x = layer_norm(x + attn, pent(f"ln1_g_{l}"), pent(f"ln1_b_{l}"))

        # ---- feed-forward + residual-fused LayerNorm ----
        h1 = gelu(mm(x, pent(f"w1_{l}")) + pent(f"b1_{l}"))
        ffn = mm(h1, pent(f"w2_{l}")) + pent(f"b2_{l}")
        x = layer_norm(x + ffn, pent(f"ln2_g_{l}"), pent(f"ln2_b_{l}"))

    # ---- CLS pooling + classification head (lane-dense 128-wide output) ----
    if bb_size > 1:
        cls = jnp.concatenate(
            [x[b * seq:b * seq + 1, :] for b in range(bb_size)], axis=0)
    else:
        cls = x[0:1, :]
    logits = mm(cls, pent("head_w")) + pent("head_b")                # (bb, 128)
    out_ref[...] = logits[:, None, :]


# ----------------------------------------------------------------------------
# Deterministic parameter init -> packed slab
# ----------------------------------------------------------------------------
def init_params(key):
    def normal(k, shape, scale=0.02):
        return scale * jax.random.normal(k, shape, dtype=jnp.float32)

    ks = iter(jax.random.split(key, 8))
    word_emb = normal(next(ks), (VOCAB, HIDDEN))
    pos_emb = normal(next(ks), (MAX_POS, HIDDEN))
    type_emb = normal(next(ks), (2, HIDDEN))
    wqkv = normal(next(ks), (N_LAYERS, HIDDEN, 3 * HIDDEN))
    wo = normal(next(ks), (N_LAYERS, HIDDEN, HIDDEN))
    w1 = normal(next(ks), (N_LAYERS, HIDDEN, INTERMEDIATE))
    w2 = normal(next(ks), (N_LAYERS, INTERMEDIATE, HIDDEN))
    head_w = normal(next(ks), (HIDDEN, NUM_LABELS))

    vals = {
        "emb_ln_g": jnp.ones((1, HIDDEN), jnp.float32),
        "emb_ln_b": jnp.zeros((1, HIDDEN), jnp.float32),
        "head_b": jnp.zeros((1, NUM_LABELS_PAD), jnp.float32),
        "head_w": jnp.zeros((HIDDEN, NUM_LABELS_PAD),
                            jnp.float32).at[:, :NUM_LABELS].set(head_w),
        # token_type_ids are always 0 in the reference forward -> fold the
        # type-0 embedding into the position table once at init.
        "pos_type_emb": pos_emb + type_emb[0][None, :],
        "word_emb": word_emb,
    }
    for l in range(N_LAYERS):
        vals[f"wqkv_{l}"] = wqkv[l]
        vals[f"bqkv_{l}"] = jnp.zeros((1, 3 * HIDDEN), jnp.float32)
        vals[f"wo_{l}"] = wo[l]
        vals[f"bo_{l}"] = jnp.zeros((1, HIDDEN), jnp.float32)
        vals[f"w1_{l}"] = w1[l]
        vals[f"b1_{l}"] = jnp.zeros((1, INTERMEDIATE), jnp.float32)
        vals[f"w2_{l}"] = w2[l]
        vals[f"b2_{l}"] = jnp.zeros((1, HIDDEN), jnp.float32)
        vals[f"ln1_g_{l}"] = jnp.ones((1, HIDDEN), jnp.float32)
        vals[f"ln1_b_{l}"] = jnp.zeros((1, HIDDEN), jnp.float32)
        vals[f"ln2_g_{l}"] = jnp.ones((1, HIDDEN), jnp.float32)
        vals[f"ln2_b_{l}"] = jnp.zeros((1, HIDDEN), jnp.float32)

    slab = jnp.zeros((SLAB_ROWS, 128), jnp.float32)
    for name, arr in vals.items():
        r0, nr, nc = LAYOUT[name]
        assert arr.shape == (nr, nc), (name, arr.shape, (nr, nc))
        slab = slab.at[r0:r0 + nr, 0:nc].set(arr.astype(jnp.float32))
    return slab


# ----------------------------------------------------------------------------
# Forward pass: everything (embedding lookup included) in one pallas_call
# ----------------------------------------------------------------------------
def full_model_forward(param_slab, input_ids, attention_mask):
    B, S = input_ids.shape
    assert B % NUM_BATCH_BLOCKS == 0
    BB = B // NUM_BATCH_BLOCKS

    ids = input_ids.reshape(B * S, 1).astype(jnp.int32)
    mask_f = attention_mask.astype(jnp.float32).reshape(B, 1, S)

    kernel = functools.partial(
        _model_kernel,
        layout=LAYOUT, bb_size=BB, seq=S, hidden=HIDDEN, n_layers=N_LAYERS,
        n_heads=N_HEADS, head_dim=HEAD_DIM, vocab=VOCAB, ln_eps=LN_EPS)

    out = pl.pallas_call(
        kernel,
        out_shape=jax.ShapeDtypeStruct((B, 1, NUM_LABELS_PAD), jnp.float32),
        grid_spec=pltpu.PrefetchScalarGridSpec(
            num_scalar_prefetch=0,
            grid=(NUM_BATCH_BLOCKS,),
            in_specs=[
                pl.BlockSpec((BB * S, 1), lambda i: (i, 0)),        # token ids
                pl.BlockSpec((BB, 1, S), lambda i: (i, 0, 0)),      # attention mask
                pl.BlockSpec((SLAB_ROWS, 128), lambda i: (0, 0)),   # all parameters
            ],
            out_specs=pl.BlockSpec((BB, 1, NUM_LABELS_PAD), lambda i: (i, 0, 0)),
            scratch_shapes=[pltpu.VMEM((BB * S, HIDDEN), jnp.float32)],  # head contexts
        ),
        compiler_params=pltpu.CompilerParams(
            dimension_semantics=("parallel",) if NUM_BATCH_BLOCKS > 1
            else ("arbitrary",)),
    )(ids, mask_f, param_slab)

    return out[:, 0, :NUM_LABELS]


# ----------------------------------------------------------------------------
if __name__ == "__main__":
    key = jax.random.PRNGKey(0)
    pkey, dkey = jax.random.split(key)
    param_slab = init_params(pkey)

    B, S = 2, 8
    input_ids = jax.random.randint(dkey, (B, S), 0, VOCAB, dtype=jnp.int32)
    # attention_mask: first sequence fully valid, second has 2 padded tokens
    attention_mask = jnp.array(
        [[1, 1, 1, 1, 1, 1, 1, 1],
         [1, 1, 1, 1, 1, 1, 0, 0]], dtype=jnp.int32)

    fwd = jax.jit(full_model_forward)
    logits = fwd(param_slab, input_ids, attention_mask)
    jax.block_until_ready(logits)
    assert logits.shape == (B, NUM_LABELS)
    assert bool(jnp.all(jnp.isfinite(logits)))
    print("KERNEL_OK")
</pallas_src>

<mosaic_0001>
module attributes {stable_mosaic.version = 11 : i64} {
  func.func @_model_kernel(%arg0: i32, %arg1: memref<16x1xi32, #tpu.memory_space<vmem>>, %arg2: memref<2x1x8xf32, #tpu.memory_space<vmem>>, %arg3: memref<560x128xf32, #tpu.memory_space<vmem>>, %arg4: memref<2x1x128xf32, #tpu.memory_space<vmem>>, %arg5: memref<16x32xf32, #tpu.memory_space<vmem>>) attributes {dimension_semantics = [#tpu.dimension_semantics<arbitrary>], iteration_bounds = array<i64: 1>, scalar_prefetch = 0 : i64, scratch_operands = 1 : i64, tpu.core_type = #tpu.core_type<tc>, window_params = [{transform_indices = @transform_0, window_bounds = array<i64: 16, 1>}, {transform_indices = @transform_1, window_bounds = array<i64: 2, 1, 8>}, {pipeline_mode = #tpu.pipeline_mode<synchronous>, transform_indices = @transform_2, window_bounds = array<i64: 560, 128>}, {transform_indices = @transform_3, window_bounds = array<i64: 2, 1, 128>}]} {
    %c0 = arith.constant 0 : index
    %c0_0 = arith.constant 0 : index
    %0 = vector.load %arg1[%c0, %c0_0] : memref<16x1xi32, #tpu.memory_space<vmem>>, vector<16x1xi32>
    %1 = tpu.iota {dimensions = array<i32: 1>} : vector<16x100xi32>
    %2 = vector.broadcast %0 : vector<16x1xi32> to vector<16x100xi32>
    %3 = arith.cmpi eq, %2, %1 : vector<16x100xi32>
    %4 = arith.extui %3 : vector<16x100xi1> to vector<16x100xi32>
    %5 = arith.sitofp %4 : vector<16x100xi32> to vector<16x100xf32>
    %c72 = arith.constant 72 : index
    %c0_1 = arith.constant 0 : index
    %6 = vector.load %arg3[%c72, %c0_1] : memref<560x128xf32, #tpu.memory_space<vmem>>, vector<100x32xf32>
    %cst = arith.constant dense<0.000000e+00> : vector<16x32xf32>
    %7 = tpu.matmul %5, %6, %cst {dimension_numbers = #tpu.dot_dimension_numbers<[1], [0], [0], [1], [0, 0, 1, 1], [], []>} : vector<16x100xf32>, vector<100x32xf32>, vector<16x32xf32> -> vector<16x32xf32>
    %c40 = arith.constant 40 : index
    %c0_2 = arith.constant 0 : index
    %8 = vector.load %arg3[%c40, %c0_2] : memref<560x128xf32, #tpu.memory_space<vmem>>, vector<8x32xf32>
    %9 = tpu.concatenate %8, %8 in 0 : vector<8x32xf32>, vector<8x32xf32> -> vector<16x32xf32>
    %10 = arith.addf %7, %9 : vector<16x32xf32>
    %c0_3 = arith.constant 0 : index
    %c0_4 = arith.constant 0 : index
    %11 = vector.load %arg3[%c0_3, %c0_4] : memref<560x128xf32, #tpu.memory_space<vmem>>, vector<1x32xf32>
    %c1 = arith.constant 1 : index
    %c0_5 = arith.constant 0 : index
    %12 = vector.load %arg3[%c1, %c0_5] : memref<560x128xf32, #tpu.memory_space<vmem>>, vector<1x32xf32>
    %cst_6 = arith.constant dense<0.000000e+00> : vector<16xf32>
    %13 = vector.multi_reduction <add>, %10, %cst_6 [1] : vector<16x32xf32> to vector<16xf32>
    %14 = vector.shape_cast %13 : vector<16xf32> to vector<16x1xf32>
    %cst_7 = arith.constant 3.200000e+01 : f32
    %15 = vector.broadcast %cst_7 : f32 to vector<16x1xf32>
    %16 = arith.divf %14, %15 : vector<16x1xf32>
    %17 = vector.broadcast %16 : vector<16x1xf32> to vector<16x32xf32>
    %18 = arith.subf %10, %17 : vector<16x32xf32>
    %19 = arith.mulf %18, %18 : vector<16x32xf32>
    %cst_8 = arith.constant dense<0.000000e+00> : vector<16xf32>
    %20 = vector.multi_reduction <add>, %19, %cst_8 [1] : vector<16x32xf32> to vector<16xf32>
    %21 = vector.shape_cast %20 : vector<16xf32> to vector<16x1xf32>
    %cst_9 = arith.constant 3.200000e+01 : f32
    %22 = vector.broadcast %cst_9 : f32 to vector<16x1xf32>
    %23 = arith.divf %21, %22 : vector<16x1xf32>
    %24 = vector.broadcast %16 : vector<16x1xf32> to vector<16x32xf32>
    %25 = arith.subf %10, %24 : vector<16x32xf32>
    %cst_10 = arith.constant 9.99999996E-13 : f32
    %26 = vector.broadcast %cst_10 : f32 to vector<16x1xf32>
    %27 = arith.addf %23, %26 : vector<16x1xf32>
    %28 = math.rsqrt %27 : vector<16x1xf32>
    %29 = vector.broadcast %28 : vector<16x1xf32> to vector<16x32xf32>
    %30 = arith.mulf %25, %29 : vector<16x32xf32>
    %31 = vector.broadcast %11 : vector<1x32xf32> to vector<16x32xf32>
    %32 = arith.mulf %30, %31 : vector<16x32xf32>
    %33 = vector.broadcast %12 : vector<1x32xf32> to vector<16x32xf32>
    %34 = arith.addf %32, %33 : vector<16x32xf32>
    %c176 = arith.constant 176 : index
    %c0_11 = arith.constant 0 : index
    %35 = vector.load %arg3[%c176, %c0_11] : memref<560x128xf32, #tpu.memory_space<vmem>>, vector<32x96xf32>
    %cst_12 = arith.constant dense<0.000000e+00> : vector<16x96xf32>
    %36 = tpu.matmul %34, %35, %cst_12 {dimension_numbers = #tpu.dot_dimension_numbers<[1], [0], [0], [1], [0, 0, 1, 1], [], []>} : vector<16x32xf32>, vector<32x96xf32>, vector<16x96xf32> -> vector<16x96xf32>
    %c208 = arith.constant 208 : index
    %c0_13 = arith.constant 0 : index
    %37 = vector.load %arg3[%c208, %c0_13] : memref<560x128xf32, #tpu.memory_space<vmem>>, vector<1x96xf32>
    %38 = vector.broadcast %37 : vector<1x96xf32> to vector<16x96xf32>
    %39 = arith.addf %36, %38 : vector<16x96xf32>
    %c0_14 = arith.constant 0 : index
    %c0_15 = arith.constant 0 : index
    %c0_16 = arith.constant 0 : index
    %40 = vector.load %arg2[%c0_14, %c0_15, %c0_16] : memref<2x1x8xf32, #tpu.memory_space<vmem>>, vector<1x1x8xf32>
    %41 = vector.shape_cast %40 : vector<1x1x8xf32> to vector<1x8xf32>
    %cst_17 = arith.constant 1.000000e+00 : f32
    %42 = vector.broadcast %cst_17 : f32 to vector<1x8xf32>
    %43 = arith.subf %42, %41 : vector<1x8xf32>
    %cst_18 = arith.constant -1.000000e+09 : f32
    %44 = vector.broadcast %cst_18 : f32 to vector<1x8xf32>
    %45 = arith.mulf %43, %44 : vector<1x8xf32>
    %46 = vector.extract_strided_slice %39 {offsets = [0, 0], sizes = [8, 16], strides = [1, 1]} : vector<16x96xf32> to vector<8x16xf32>
    %47 = vector.extract_strided_slice %39 {offsets = [0, 32], sizes = [8, 16], strides = [1, 1]} : vector<16x96xf32> to vector<8x16xf32>
    %48 = vector.extract_strided_slice %39 {offsets = [0, 64], sizes = [8, 16], strides = [1, 1]} : vector<16x96xf32> to vector<8x16xf32>
    %cst_19 = arith.constant dense<0.000000e+00> : vector<8x8xf32>
    %49 = tpu.matmul %46, %47, %cst_19 {dimension_numbers = #tpu.dot_dimension_numbers<[1], [1], [0], [0], [0, 0, 1, 0], [], []>} : vector<8x16xf32>, vector<8x16xf32>, vector<8x8xf32> -> vector<8x8xf32>
    %cst_20 = arith.constant 2.500000e-01 : f32
    %50 = vector.broadcast %cst_20 : f32 to vector<8x8xf32>
    %51 = arith.mulf %49, %50 : vector<8x8xf32>
    %52 = vector.broadcast %45 : vector<1x8xf32> to vector<8x8xf32>
    %53 = arith.addf %51, %52 : vector<8x8xf32>
    %cst_21 = arith.constant dense<0xFF800000> : vector<8xf32>
    %54 = vector.multi_reduction <maximumf>, %53, %cst_21 [1] : vector<8x8xf32> to vector<8xf32>
    %55 = vector.shape_cast %54 : vector<8xf32> to vector<8x1xf32>
    %56 = vector.broadcast %55 : vector<8x1xf32> to vector<8x8xf32>
    %57 = arith.subf %53, %56 : vector<8x8xf32>
    %58 = math.exp %57 : vector<8x8xf32>
    %cst_22 = arith.constant dense<0.000000e+00> : vector<8xf32>
    %59 = vector.multi_reduction <add>, %58, %cst_22 [1] : vector<8x8xf32> to vector<8xf32>
    %60 = vector.shape_cast %59 : vector<8xf32> to vector<8x1xf32>
    %61 = vector.broadcast %60 : vector<8x1xf32> to vector<8x8xf32>
    %62 = arith.divf %58, %61 : vector<8x8xf32>
    %cst_23 = arith.constant dense<0.000000e+00> : vector<8x16xf32>
    %63 = tpu.matmul %62, %48, %cst_23 {dimension_numbers = #tpu.dot_dimension_numbers<[1], [0], [0], [1], [0, 0, 1, 1], [], []>} : vector<8x8xf32>, vector<8x16xf32>, vector<8x16xf32> -> vector<8x16xf32>
    %c0_24 = arith.constant 0 : index
    %c0_25 = arith.constant 0 : index
    %64 = vector.load %arg5[%c0_24, %c0_25] : memref<16x32xf32, #tpu.memory_space<vmem>>, vector<8x16xf32>
    tpu.vector_store %arg5[%c0_24, %c0_25], %63 {strides = array<i32>} : memref<16x32xf32, #tpu.memory_space<vmem>>, vector<8x16xf32>,
    %65 = vector.extract_strided_slice %39 {offsets = [0, 16], sizes = [8, 16], strides = [1, 1]} : vector<16x96xf32> to vector<8x16xf32>
    %66 = vector.extract_strided_slice %39 {offsets = [0, 48], sizes = [8, 16], strides = [1, 1]} : vector<16x96xf32> to vector<8x16xf32>
    %67 = vector.extract_strided_slice %39 {offsets = [0, 80], sizes = [8, 16], strides = [1, 1]} : vector<16x96xf32> to vector<8x16xf32>
    %cst_26 = arith.constant dense<0.000000e+00> : vector<8x8xf32>
    %68 = tpu.matmul %65, %66, %cst_26 {dimension_numbers = #tpu.dot_dimension_numbers<[1], [1], [0], [0], [0, 0, 1, 0], [], []>} : vector<8x16xf32>, vector<8x16xf32>, vector<8x8xf32> -> vector<8x8xf32>
    %cst_27 = arith.constant 2.500000e-01 : f32
    %69 = vector.broadcast %cst_27 : f32 to vector<8x8xf32>
    %70 = arith.mulf %68, %69 : vector<8x8xf32>
    %71 = vector.broadcast %45 : vector<1x8xf32> to vector<8x8xf32>
    %72 = arith.addf %70, %71 : vector<8x8xf32>
    %cst_28 = arith.constant dense<0xFF800000> : vector<8xf32>
    %73 = vector.multi_reduction <maximumf>, %72, %cst_28 [1] : vector<8x8xf32> to vector<8xf32>
    %74 = vector.shape_cast %73 : vector<8xf32> to vector<8x1xf32>
    %75 = vector.broadcast %74 : vector<8x1xf32> to vector<8x8xf32>
    %76 = arith.subf %72, %75 : vector<8x8xf32>
    %77 = math.exp %76 : vector<8x8xf32>
    %cst_29 = arith.constant dense<0.000000e+00> : vector<8xf32>
    %78 = vector.multi_reduction <add>, %77, %cst_29 [1] : vector<8x8xf32> to vector<8xf32>
    %79 = vector.shape_cast %78 : vector<8xf32> to vector<8x1xf32>
    %80 = vector.broadcast %79 : vector<8x1xf32> to vector<8x8xf32>
    %81 = arith.divf %77, %80 : vector<8x8xf32>
    %cst_30 = arith.constant dense<0.000000e+00> : vector<8x16xf32>
    %82 = tpu.matmul %81, %67, %cst_30 {dimension_numbers = #tpu.dot_dimension_numbers<[1], [0], [0], [1], [0, 0, 1, 1], [], []>} : vector<8x8xf32>, vector<8x16xf32>, vector<8x16xf32> -> vector<8x16xf32>
    %c0_31 = arith.constant 0 : index
    %c16 = arith.constant 16 : index
    %83 = vector.load %arg5[%c0_31, %c16] : memref<16x32xf32, #tpu.memory_space<vmem>>, vector<8x16xf32>
    tpu.vector_store %arg5[%c0_31, %c16], %82 {strides = array<i32>} : memref<16x32xf32, #tpu.memory_space<vmem>>, vector<8x16xf32>,
    %c1_32 = arith.constant 1 : index
    %c0_33 = arith.constant 0 : index
    %c0_34 = arith.constant 0 : index
    %84 = vector.load %arg2[%c1_32, %c0_33, %c0_34] : memref<2x1x8xf32, #tpu.memory_space<vmem>>, vector<1x1x8xf32>
    %85 = vector.shape_cast %84 : vector<1x1x8xf32> to vector<1x8xf32>
    %cst_35 = arith.constant 1.000000e+00 : f32
    %86 = vector.broadcast %cst_35 : f32 to vector<1x8xf32>
    %87 = arith.subf %86, %85 : vector<1x8xf32>
    %cst_36 = arith.constant -1.000000e+09 : f32
    %88 = vector.broadcast %cst_36 : f32 to vector<1x8xf32>
    %89 = arith.mulf %87, %88 : vector<1x8xf32>
    %90 = vector.extract_strided_slice %39 {offsets = [8, 0], sizes = [8, 16], strides = [1, 1]} : vector<16x96xf32> to vector<8x16xf32>
    %91 = vector.extract_strided_slice %39 {offsets = [8, 32], sizes = [8, 16], strides = [1, 1]} : vector<16x96xf32> to vector<8x16xf32>
    %92 = vector.extract_strided_slice %39 {offsets = [8, 64], sizes = [8, 16], strides = [1, 1]} : vector<16x96xf32> to vector<8x16xf32>
    %cst_37 = arith.constant dense<0.000000e+00> : vector<8x8xf32>
    %93 = tpu.matmul %90, %91, %cst_37 {dimension_numbers = #tpu.dot_dimension_numbers<[1], [1], [0], [0], [0, 0, 1, 0], [], []>} : vector<8x16xf32>, vector<8x16xf32>, vector<8x8xf32> -> vector<8x8xf32>
    %cst_38 = arith.constant 2.500000e-01 : f32
    %94 = vector.broadcast %cst_38 : f32 to vector<8x8xf32>
    %95 = arith.mulf %93, %94 : vector<8x8xf32>
    %96 = vector.broadcast %89 : vector<1x8xf32> to vector<8x8xf32>
    %97 = arith.addf %95, %96 : vector<8x8xf32>
    %cst_39 = arith.constant dense<0xFF800000> : vector<8xf32>
    %98 = vector.multi_reduction <maximumf>, %97, %cst_39 [1] : vector<8x8xf32> to vector<8xf32>
    %99 = vector.shape_cast %98 : vector<8xf32> to vector<8x1xf32>
    %100 = vector.broadcast %99 : vector<8x1xf32> to vector<8x8xf32>
    %101 = arith.subf %97, %100 : vector<8x8xf32>
    %102 = math.exp %101 : vector<8x8xf32>
    %cst_40 = arith.constant dense<0.000000e+00> : vector<8xf32>
    %103 = vector.multi_reduction <add>, %102, %cst_40 [1] : vector<8x8xf32> to vector<8xf32>
    %104 = vector.shape_cast %103 : vector<8xf32> to vector<8x1xf32>
    %105 = vector.broadcast %104 : vector<8x1xf32> to vector<8x8xf32>
    %106 = arith.divf %102, %105 : vector<8x8xf32>
    %cst_41 = arith.constant dense<0.000000e+00> : vector<8x16xf32>
    %107 = tpu.matmul %106, %92, %cst_41 {dimension_numbers = #tpu.dot_dimension_numbers<[1], [0], [0], [1], [0, 0, 1, 1], [], []>} : vector<8x8xf32>, vector<8x16xf32>, vector<8x16xf32> -> vector<8x16xf32>
    %c8 = arith.constant 8 : index
    %c0_42 = arith.constant 0 : index
    %108 = vector.load %arg5[%c8, %c0_42] : memref<16x32xf32, #tpu.memory_space<vmem>>, vector<8x16xf32>
    tpu.vector_store %arg5[%c8, %c0_42], %107 {strides = array<i32>} : memref<16x32xf32, #tpu.memory_space<vmem>>, vector<8x16xf32>,
    %109 = vector.extract_strided_slice %39 {offsets = [8, 16], sizes = [8, 16], strides = [1, 1]} : vector<16x96xf32> to vector<8x16xf32>
    %110 = vector.extract_strided_slice %39 {offsets = [8, 48], sizes = [8, 16], strides = [1, 1]} : vector<16x96xf32> to vector<8x16xf32>
    %111 = vector.extract_strided_slice %39 {offsets = [8, 80], sizes = [8, 16], strides = [1, 1]} : vector<16x96xf32> to vector<8x16xf32>
    %cst_43 = arith.constant dense<0.000000e+00> : vector<8x8xf32>
    %112 = tpu.matmul %109, %110, %cst_43 {dimension_numbers = #tpu.dot_dimension_numbers<[1], [1], [0], [0], [0, 0, 1, 0], [], []>} : vector<8x16xf32>, vector<8x16xf32>, vector<8x8xf32> -> vector<8x8xf32>
    %cst_44 = arith.constant 2.500000e-01 : f32
    %113 = vector.broadcast %cst_44 : f32 to vector<8x8xf32>
    %114 = arith.mulf %112, %113 : vector<8x8xf32>
    %115 = vector.broadcast %89 : vector<1x8xf32> to vector<8x8xf32>
    %116 = arith.addf %114, %115 : vector<8x8xf32>
    %cst_45 = arith.constant dense<0xFF800000> : vector<8xf32>
    %117 = vector.multi_reduction <maximumf>, %116, %cst_45 [1] : vector<8x8xf32> to vector<8xf32>
    %118 = vector.shape_cast %117 : vector<8xf32> to vector<8x1xf32>
    %119 = vector.broadcast %118 : vector<8x1xf32> to vector<8x8xf32>
    %120 = arith.subf %116, %119 : vector<8x8xf32>
    %121 = math.exp %120 : vector<8x8xf32>
    %cst_46 = arith.constant dense<0.000000e+00> : vector<8xf32>
    %122 = vector.multi_reduction <add>, %121, %cst_46 [1] : vector<8x8xf32> to vector<8xf32>
    %123 = vector.shape_cast %122 : vector<8xf32> to vector<8x1xf32>
    %124 = vector.broadcast %123 : vector<8x1xf32> to vector<8x8xf32>
    %125 = arith.divf %121, %124 : vector<8x8xf32>
    %cst_47 = arith.constant dense<0.000000e+00> : vector<8x16xf32>
    %126 = tpu.matmul %125, %111, %cst_47 {dimension_numbers = #tpu.dot_dimension_numbers<[1], [0], [0], [1], [0, 0, 1, 1], [], []>} : vector<8x8xf32>, vector<8x16xf32>, vector<8x16xf32> -> vector<8x16xf32>
    %c8_48 = arith.constant 8 : index
    %c16_49 = arith.constant 16 : index
    %127 = vector.load %arg5[%c8_48, %c16_49] : memref<16x32xf32, #tpu.memory_space<vmem>>, vector<8x16xf32>
    tpu.vector_store %arg5[%c8_48, %c16_49], %126 {strides = array<i32>} : memref<16x32xf32, #tpu.memory_space<vmem>>, vector<8x16xf32>,
    %c0_50 = arith.constant 0 : index
    %c0_51 = arith.constant 0 : index
    %128 = vector.load %arg5[%c0_50, %c0_51] : memref<16x32xf32, #tpu.memory_space<vmem>>, vector<16x32xf32>
    %c216 = arith.constant 216 : index
    %c0_52 = arith.constant 0 : index
    %129 = vector.load %arg3[%c216, %c0_52] : memref<560x128xf32, #tpu.memory_space<vmem>>, vector<32x32xf32>
    %cst_53 = arith.constant dense<0.000000e+00> : vector<16x32xf32>
    %130 = tpu.matmul %128, %129, %cst_53 {dimension_numbers = #tpu.dot_dimension_numbers<[1], [0], [0], [1], [0, 0, 1, 1], [], []>} : vector<16x32xf32>, vector<32x32xf32>, vector<16x32xf32> -> vector<16x32xf32>
    %c248 = arith.constant 248 : index
    %c0_54 = arith.constant 0 : index
    %131 = vector.load %arg3[%c248, %c0_54] : memref<560x128xf32, #tpu.memory_space<vmem>>, vector<1x32xf32>
    %132 = vector.broadcast %131 : vector<1x32xf32> to vector<16x32xf32>
    %133 = arith.addf %130, %132 : vector<16x32xf32>
    %134 = arith.addf %34, %133 : vector<16x32xf32>
    %c361 = arith.constant 361 : index
    %c0_55 = arith.constant 0 : index
    %135 = vector.load %arg3[%c361, %c0_55] : memref<560x128xf32, #tpu.memory_space<vmem>>, vector<1x32xf32>
    %c362 = arith.constant 362 : index
    %c0_56 = arith.constant 0 : index
    %136 = vector.load %arg3[%c362, %c0_56] : memref<560x128xf32, #tpu.memory_space<vmem>>, vector<1x32xf32>
    %cst_57 = arith.constant dense<0.000000e+00> : vector<16xf32>
    %137 = vector.multi_reduction <add>, %134, %cst_57 [1] : vector<16x32xf32> to vector<16xf32>
    %138 = vector.shape_cast %137 : vector<16xf32> to vector<16x1xf32>
    %cst_58 = arith.constant 3.200000e+01 : f32
    %139 = vector.broadcast %cst_58 : f32 to vector<16x1xf32>
    %140 = arith.divf %138, %139 : vector<16x1xf32>
    %141 = vector.broadcast %140 : vector<16x1xf32> to vector<16x32xf32>
    %142 = arith.subf %134, %141 : vector<16x32xf32>
    %143 = arith.mulf %142, %142 : vector<16x32xf32>
    %cst_59 = arith.constant dense<0.000000e+00> : vector<16xf32>
    %144 = vector.multi_reduction <add>, %143, %cst_59 [1] : vector<16x32xf32> to vector<16xf32>
    %145 = vector.shape_cast %144 : vector<16xf32> to vector<16x1xf32>
    %cst_60 = arith.constant 3.200000e+01 : f32
    %146 = vector.broadcast %cst_60 : f32 to vector<16x1xf32>
    %147 = arith.divf %145, %146 : vector<16x1xf32>
    %148 = vector.broadcast %140 : vector<16x1xf32> to vector<16x32xf32>
    %149 = arith.subf %134, %148 : vector<16x32xf32>
    %cst_61 = arith.constant 9.99999996E-13 : f32
    %150 = vector.broadcast %cst_61 : f32 to vector<16x1xf32>
    %151 = arith.addf %147, %150 : vector<16x1xf32>
    %152 = math.rsqrt %151 : vector<16x1xf32>
    %153 = vector.broadcast %152 : vector<16x1xf32> to vector<16x32xf32>
    %154 = arith.mulf %149, %153 : vector<16x32xf32>
    %155 = vector.broadcast %135 : vector<1x32xf32> to vector<16x32xf32>
    %156 = arith.mulf %154, %155 : vector<16x32xf32>
    %157 = vector.broadcast %136 : vector<1x32xf32> to vector<16x32xf32>
    %158 = arith.addf %156, %157 : vector<16x32xf32>
    %c256 = arith.constant 256 : index
    %c0_62 = arith.constant 0 : index
    %159 = vector.load %arg3[%c256, %c0_62] : memref<560x128xf32, #tpu.memory_space<vmem>>, vector<32x64xf32>
    %cst_63 = arith.constant dense<0.000000e+00> : vector<16x64xf32>
    %160 = tpu.matmul %158, %159, %cst_63 {dimension_numbers = #tpu.dot_dimension_numbers<[1], [0], [0], [1], [0, 0, 1, 1], [], []>} : vector<16x32xf32>, vector<32x64xf32>, vector<16x64xf32> -> vector<16x64xf32>
    %c288 = arith.constant 288 : index
    %c0_64 = arith.constant 0 : index
    %161 = vector.load %arg3[%c288, %c0_64] : memref<560x128xf32, #tpu.memory_space<vmem>>, vector<1x64xf32>
    %162 = vector.broadcast %161 : vector<1x64xf32> to vector<16x64xf32>
    %163 = arith.addf %160, %162 : vector<16x64xf32>
    %cst_65 = arith.constant 5.000000e-01 : f32
    %164 = vector.broadcast %cst_65 : f32 to vector<16x64xf32>
    %165 = arith.mulf %164, %163 : vector<16x64xf32>
    %cst_66 = arith.constant 4.471500e-02 : f32
    %166 = vector.broadcast %cst_66 : f32 to vector<16x64xf32>
    %167 = arith.mulf %166, %163 : vector<16x64xf32>
    %168 = arith.mulf %167, %163 : vector<16x64xf32>
    %169 = arith.mulf %168, %163 : vector<16x64xf32>
    %170 = arith.addf %163, %169 : vector<16x64xf32>
    %cst_67 = arith.constant 0.797884583 : f32
    %171 = vector.broadcast %cst_67 : f32 to vector<16x64xf32>
    %172 = arith.mulf %171, %170 : vector<16x64xf32>
    %173 = math.tanh %172 : vector<16x64xf32>
    %cst_68 = arith.constant 1.000000e+00 : f32
    %174 = vector.broadcast %cst_68 : f32 to vector<16x64xf32>
    %175 = arith.addf %174, %173 : vector<16x64xf32>
    %176 = arith.mulf %165, %175 : vector<16x64xf32>
    %c296 = arith.constant 296 : index
    %c0_69 = arith.constant 0 : index
    %177 = vector.load %arg3[%c296, %c0_69] : memref<560x128xf32, #tpu.memory_space<vmem>>, vector<64x32xf32>
    %cst_70 = arith.constant dense<0.000000e+00> : vector<16x32xf32>
    %178 = tpu.matmul %176, %177, %cst_70 {dimension_numbers = #tpu.dot_dimension_numbers<[1], [0], [0], [1], [0, 0, 1, 1], [], []>} : vector<16x64xf32>, vector<64x32xf32>, vector<16x32xf32> -> vector<16x32xf32>
    %c360 = arith.constant 360 : index
    %c0_71 = arith.constant 0 : index
    %179 = vector.load %arg3[%c360, %c0_71] : memref<560x128xf32, #tpu.memory_space<vmem>>, vector<1x32xf32>
    %180 = vector.broadcast %179 : vector<1x32xf32> to vector<16x32xf32>
    %181 = arith.addf %178, %180 : vector<16x32xf32>
    %182 = arith.addf %158, %181 : vector<16x32xf32>
    %c363 = arith.constant 363 : index
    %c0_72 = arith.constant 0 : index
    %183 = vector.load %arg3[%c363, %c0_72] : memref<560x128xf32, #tpu.memory_space<vmem>>, vector<1x32xf32>
    %c364 = arith.constant 364 : index
    %c0_73 = arith.constant 0 : index
    %184 = vector.load %arg3[%c364, %c0_73] : memref<560x128xf32, #tpu.memory_space<vmem>>, vector<1x32xf32>
    %cst_74 = arith.constant dense<0.000000e+00> : vector<16xf32>
    %185 = vector.multi_reduction <add>, %182, %cst_74 [1] : vector<16x32xf32> to vector<16xf32>
    %186 = vector.shape_cast %185 : vector<16xf32> to vector<16x1xf32>
    %cst_75 = arith.constant 3.200000e+01 : f32
    %187 = vector.broadcast %cst_75 : f32 to vector<16x1xf32>
    %188 = arith.divf %186, %187 : vector<16x1xf32>
    %189 = vector.broadcast %188 : vector<16x1xf32> to vector<16x32xf32>
    %190 = arith.subf %182, %189 : vector<16x32xf32>
    %191 = arith.mulf %190, %190 : vector<16x32xf32>
    %cst_76 = arith.constant dense<0.000000e+00> : vector<16xf32>
    %192 = vector.multi_reduction <add>, %191, %cst_76 [1] : vector<16x32xf32> to vector<16xf32>
    %193 = vector.shape_cast %192 : vector<16xf32> to vector<16x1xf32>
    %cst_77 = arith.constant 3.200000e+01 : f32
    %194 = vector.broadcast %cst_77 : f32 to vector<16x1xf32>
    %195 = arith.divf %193, %194 : vector<16x1xf32>
    %196 = vector.broadcast %188 : vector<16x1xf32> to vector<16x32xf32>
    %197 = arith.subf %182, %196 : vector<16x32xf32>
    %cst_78 = arith.constant 9.99999996E-13 : f32
    %198 = vector.broadcast %cst_78 : f32 to vector<16x1xf32>
    %199 = arith.addf %195, %198 : vector<16x1xf32>
    %200 = math.rsqrt %199 : vector<16x1xf32>
    %201 = vector.broadcast %200 : vector<16x1xf32> to vector<16x32xf32>
    %202 = arith.mulf %197, %201 : vector<16x32xf32>
    %203 = vector.broadcast %183 : vector<1x32xf32> to vector<16x32xf32>
    %204 = arith.mulf %202, %203 : vector<16x32xf32>
    %205 = vector.broadcast %184 : vector<1x32xf32> to vector<16x32xf32>
    %206 = arith.addf %204, %205 : vector<16x32xf32>
    %c368 = arith.constant 368 : index
    %c0_79 = arith.constant 0 : index
    %207 = vector.load %arg3[%c368, %c0_79] : memref<560x128xf32, #tpu.memory_space<vmem>>, vector<32x96xf32>
    %cst_80 = arith.constant dense<0.000000e+00> : vector<16x96xf32>
    %208 = tpu.matmul %206, %207, %cst_80 {dimension_numbers = #tpu.dot_dimension_numbers<[1], [0], [0], [1], [0, 0, 1, 1], [], []>} : vector<16x32xf32>, vector<32x96xf32>, vector<16x96xf32> -> vector<16x96xf32>
    %c400 = arith.constant 400 : index
    %c0_81 = arith.constant 0 : index
    %209 = vector.load %arg3[%c400, %c0_81] : memref<560x128xf32, #tpu.memory_space<vmem>>, vector<1x96xf32>
    %210 = vector.broadcast %209 : vector<1x96xf32> to vector<16x96xf32>
    %211 = arith.addf %208, %210 : vector<16x96xf32>
    %c0_82 = arith.constant 0 : index
    %c0_83 = arith.constant 0 : index
    %c0_84 = arith.constant 0 : index
    %212 = vector.load %arg2[%c0_82, %c0_83, %c0_84] : memref<2x1x8xf32, #tpu.memory_space<vmem>>, vector<1x1x8xf32>
    %213 = vector.shape_cast %212 : vector<1x1x8xf32> to vector<1x8xf32>
    %cst_85 = arith.constant 1.000000e+00 : f32
    %214 = vector.broadcast %cst_85 : f32 to vector<1x8xf32>
    %215 = arith.subf %214, %213 : vector<1x8xf32>
    %cst_86 = arith.constant -1.000000e+09 : f32
    %216 = vector.broadcast %cst_86 : f32 to vector<1x8xf32>
    %217 = arith.mulf %215, %216 : vector<1x8xf32>
    %218 = vector.extract_strided_slice %211 {offsets = [0, 0], sizes = [8, 16], strides = [1, 1]} : vector<16x96xf32> to vector<8x16xf32>
    %219 = vector.extract_strided_slice %211 {offsets = [0, 32], sizes = [8, 16], strides = [1, 1]} : vector<16x96xf32> to vector<8x16xf32>
    %220 = vector.extract_strided_slice %211 {offsets = [0, 64], sizes = [8, 16], strides = [1, 1]} : vector<16x96xf32> to vector<8x16xf32>
    %cst_87 = arith.constant dense<0.000000e+00> : vector<8x8xf32>
    %221 = tpu.matmul %218, %219, %cst_87 {dimension_numbers = #tpu.dot_dimension_numbers<[1], [1], [0], [0], [0, 0, 1, 0], [], []>} : vector<8x16xf32>, vector<8x16xf32>, vector<8x8xf32> -> vector<8x8xf32>
    %cst_88 = arith.constant 2.500000e-01 : f32
    %222 = vector.broadcast %cst_88 : f32 to vector<8x8xf32>
    %223 = arith.mulf %221, %222 : vector<8x8xf32>
    %224 = vector.broadcast %217 : vector<1x8xf32> to vector<8x8xf32>
    %225 = arith.addf %223, %224 : vector<8x8xf32>
    %cst_89 = arith.constant dense<0xFF800000> : vector<8xf32>
    %226 = vector.multi_reduction <maximumf>, %225, %cst_89 [1] : vector<8x8xf32> to vector<8xf32>
    %227 = vector.shape_cast %226 : vector<8xf32> to vector<8x1xf32>
    %228 = vector.broadcast %227 : vector<8x1xf32> to vector<8x8xf32>
    %229 = arith.subf %225, %228 : vector<8x8xf32>
    %230 = math.exp %229 : vector<8x8xf32>
    %cst_90 = arith.constant dense<0.000000e+00> : vector<8xf32>
    %231 = vector.multi_reduction <add>, %230, %cst_90 [1] : vector<8x8xf32> to vector<8xf32>
    %232 = vector.shape_cast %231 : vector<8xf32> to vector<8x1xf32>
    %233 = vector.broadcast %232 : vector<8x1xf32> to vector<8x8xf32>
    %234 = arith.divf %230, %233 : vector<8x8xf32>
    %cst_91 = arith.constant dense<0.000000e+00> : vector<8x16xf32>
    %235 = tpu.matmul %234, %220, %cst_91 {dimension_numbers = #tpu.dot_dimension_numbers<[1], [0], [0], [1], [0, 0, 1, 1], [], []>} : vector<8x8xf32>, vector<8x16xf32>, vector<8x16xf32> -> vector<8x16xf32>
    %c0_92 = arith.constant 0 : index
    %c0_93 = arith.constant 0 : index
    %236 = vector.load %arg5[%c0_92, %c0_93] : memref<16x32xf32, #tpu.memory_space<vmem>>, vector<8x16xf32>
    tpu.vector_store %arg5[%c0_92, %c0_93], %235 {strides = array<i32>} : memref<16x32xf32, #tpu.memory_space<vmem>>, vector<8x16xf32>,
    %237 = vector.extract_strided_slice %211 {offsets = [0, 16], sizes = [8, 16], strides = [1, 1]} : vector<16x96xf32> to vector<8x16xf32>
    %238 = vector.extract_strided_slice %211 {offsets = [0, 48], sizes = [8, 16], strides = [1, 1]} : vector<16x96xf32> to vector<8x16xf32>
    %239 = vector.extract_strided_slice %211 {offsets = [0, 80], sizes = [8, 16], strides = [1, 1]} : vector<16x96xf32> to vector<8x16xf32>
    %cst_94 = arith.constant dense<0.000000e+00> : vector<8x8xf32>
    %240 = tpu.matmul %237, %238, %cst_94 {dimension_numbers = #tpu.dot_dimension_numbers<[1], [1], [0], [0], [0, 0, 1, 0], [], []>} : vector<8x16xf32>, vector<8x16xf32>, vector<8x8xf32> -> vector<8x8xf32>
    %cst_95 = arith.constant 2.500000e-01 : f32
    %241 = vector.broadcast %cst_95 : f32 to vector<8x8xf32>
    %242 = arith.mulf %240, %241 : vector<8x8xf32>
    %243 = vector.broadcast %217 : vector<1x8xf32> to vector<8x8xf32>
    %244 = arith.addf %242, %243 : vector<8x8xf32>
    %cst_96 = arith.constant dense<0xFF800000> : vector<8xf32>
    %245 = vector.multi_reduction <maximumf>, %244, %cst_96 [1] : vector<8x8xf32> to vector<8xf32>
    %246 = vector.shape_cast %245 : vector<8xf32> to vector<8x1xf32>
    %247 = vector.broadcast %246 : vector<8x1xf32> to vector<8x8xf32>
    %248 = arith.subf %244, %247 : vector<8x8xf32>
    %249 = math.exp %248 : vector<8x8xf32>
    %cst_97 = arith.constant dense<0.000000e+00> : vector<8xf32>
    %250 = vector.multi_reduction <add>, %249, %cst_97 [1] : vector<8x8xf32> to vector<8xf32>
    %251 = vector.shape_cast %250 : vector<8xf32> to vector<8x1xf32>
    %252 = vector.broadcast %251 : vector<8x1xf32> to vector<8x8xf32>
    %253 = arith.divf %249, %252 : vector<8x8xf32>
    %cst_98 = arith.constant dense<0.000000e+00> : vector<8x16xf32>
    %254 = tpu.matmul %253, %239, %cst_98 {dimension_numbers = #tpu.dot_dimension_numbers<[1], [0], [0], [1], [0, 0, 1, 1], [], []>} : vector<8x8xf32>, vector<8x16xf32>, vector<8x16xf32> -> vector<8x16xf32>
    %c0_99 = arith.constant 0 : index
    %c16_100 = arith.constant 16 : index
    %255 = vector.load %arg5[%c0_99, %c16_100] : memref<16x32xf32, #tpu.memory_space<vmem>>, vector<8x16xf32>
    tpu.vector_store %arg5[%c0_99, %c16_100], %254 {strides = array<i32>} : memref<16x32xf32, #tpu.memory_space<vmem>>, vector<8x16xf32>,
    %c1_101 = arith.constant 1 : index
    %c0_102 = arith.constant 0 : index
    %c0_103 = arith.constant 0 : index
    %256 = vector.load %arg2[%c1_101, %c0_102, %c0_103] : memref<2x1x8xf32, #tpu.memory_space<vmem>>, vector<1x1x8xf32>
    %257 = vector.shape_cast %256 : vector<1x1x8xf32> to vector<1x8xf32>
    %cst_104 = arith.constant 1.000000e+00 : f32
    %258 = vector.broadcast %cst_104 : f32 to vector<1x8xf32>
    %259 = arith.subf %258, %257 : vector<1x8xf32>
    %cst_105 = arith.constant -1.000000e+09 : f32
    %260 = vector.broadcast %cst_105 : f32 to vector<1x8xf32>
    %261 = arith.mulf %259, %260 : vector<1x8xf32>
    %262 = vector.extract_strided_slice %211 {offsets = [8, 0], sizes = [8, 16], strides = [1, 1]} : vector<16x96xf32> to vector<8x16xf32>
    %263 = vector.extract_strided_slice %211 {offsets = [8, 32], sizes = [8, 16], strides = [1, 1]} : vector<16x96xf32> to vector<8x16xf32>
    %264 = vector.extract_strided_slice %211 {offsets = [8, 64], sizes = [8, 16], strides = [1, 1]} : vector<16x96xf32> to vector<8x16xf32>
    %cst_106 = arith.constant dense<0.000000e+00> : vector<8x8xf32>
    %265 = tpu.matmul %262, %263, %cst_106 {dimension_numbers = #tpu.dot_dimension_numbers<[1], [1], [0], [0], [0, 0, 1, 0], [], []>} : vector<8x16xf32>, vector<8x16xf32>, vector<8x8xf32> -> vector<8x8xf32>
    %cst_107 = arith.constant 2.500000e-01 : f32
    %266 = vector.broadcast %cst_107 : f32 to vector<8x8xf32>
    %267 = arith.mulf %265, %266 : vector<8x8xf32>
    %268 = vector.broadcast %261 : vector<1x8xf32> to vector<8x8xf32>
    %269 = arith.addf %267, %268 : vector<8x8xf32>
    %cst_108 = arith.constant dense<0xFF800000> : vector<8xf32>
    %270 = vector.multi_reduction <maximumf>, %269, %cst_108 [1] : vector<8x8xf32> to vector<8xf32>
    %271 = vector.shape_cast %270 : vector<8xf32> to vector<8x1xf32>
    %272 = vector.broadcast %271 : vector<8x1xf32> to vector<8x8xf32>
    %273 = arith.subf %269, %272 : vector<8x8xf32>
    %274 = math.exp %273 : vector<8x8xf32>
    %cst_109 = arith.constant dense<0.000000e+00> : vector<8xf32>
    %275 = vector.multi_reduction <add>, %274, %cst_109 [1] : vector<8x8xf32> to vector<8xf32>
    %276 = vector.shape_cast %275 : vector<8xf32> to vector<8x1xf32>
    %277 = vector.broadcast %276 : vector<8x1xf32> to vector<8x8xf32>
    %278 = arith.divf %274, %277 : vector<8x8xf32>
    %cst_110 = arith.constant dense<0.000000e+00> : vector<8x16xf32>
    %279 = tpu.matmul %278, %264, %cst_110 {dimension_numbers = #tpu.dot_dimension_numbers<[1], [0], [0], [1], [0, 0, 1, 1], [], []>} : vector<8x8xf32>, vector<8x16xf32>, vector<8x16xf32> -> vector<8x16xf32>
    %c8_111 = arith.constant 8 : index
    %c0_112 = arith.constant 0 : index
    %280 = vector.load %arg5[%c8_111, %c0_112] : memref<16x32xf32, #tpu.memory_space<vmem>>, vector<8x16xf32>
    tpu.vector_store %arg5[%c8_111, %c0_112], %279 {strides = array<i32>} : memref<16x32xf32, #tpu.memory_space<vmem>>, vector<8x16xf32>,
    %281 = vector.extract_strided_slice %211 {offsets = [8, 16], sizes = [8, 16], strides = [1, 1]} : vector<16x96xf32> to vector<8x16xf32>
    %282 = vector.extract_strided_slice %211 {offsets = [8, 48], sizes = [8, 16], strides = [1, 1]} : vector<16x96xf32> to vector<8x16xf32>
    %283 = vector.extract_strided_slice %211 {offsets = [8, 80], sizes = [8, 16], strides = [1, 1]} : vector<16x96xf32> to vector<8x16xf32>
    %cst_113 = arith.constant dense<0.000000e+00> : vector<8x8xf32>
    %284 = tpu.matmul %281, %282, %cst_113 {dimension_numbers = #tpu.dot_dimension_numbers<[1], [1], [0], [0], [0, 0, 1, 0], [], []>} : vector<8x16xf32>, vector<8x16xf32>, vector<8x8xf32> -> vector<8x8xf32>
    %cst_114 = arith.constant 2.500000e-01 : f32
    %285 = vector.broadcast %cst_114 : f32 to vector<8x8xf32>
    %286 = arith.mulf %284, %285 : vector<8x8xf32>
    %287 = vector.broadcast %261 : vector<1x8xf32> to vector<8x8xf32>
    %288 = arith.addf %286, %287 : vector<8x8xf32>
    %cst_115 = arith.constant dense<0xFF800000> : vector<8xf32>
    %289 = vector.multi_reduction <maximumf>, %288, %cst_115 [1] : vector<8x8xf32> to vector<8xf32>
    %290 = vector.shape_cast %289 : vector<8xf32> to vector<8x1xf32>
    %291 = vector.broadcast %290 : vector<8x1xf32> to vector<8x8xf32>
    %292 = arith.subf %288, %291 : vector<8x8xf32>
    %293 = math.exp %292 : vector<8x8xf32>
    %cst_116 = arith.constant dense<0.000000e+00> : vector<8xf32>
    %294 = vector.multi_reduction <add>, %293, %cst_116 [1] : vector<8x8xf32> to vector<8xf32>
    %295 = vector.shape_cast %294 : vector<8xf32> to vector<8x1xf32>
    %296 = vector.broadcast %295 : vector<8x1xf32> to vector<8x8xf32>
    %297 = arith.divf %293, %296 : vector<8x8xf32>
    %cst_117 = arith.constant dense<0.000000e+00> : vector<8x16xf32>
    %298 = tpu.matmul %297, %283, %cst_117 {dimension_numbers = #tpu.dot_dimension_numbers<[1], [0], [0], [1], [0, 0, 1, 1], [], []>} : vector<8x8xf32>, vector<8x16xf32>, vector<8x16xf32> -> vector<8x16xf32>
    %c8_118 = arith.constant 8 : index
    %c16_119 = arith.constant 16 : index
    %299 = vector.load %arg5[%c8_118, %c16_119] : memref<16x32xf32, #tpu.memory_space<vmem>>, vector<8x16xf32>
    tpu.vector_store %arg5[%c8_118, %c16_119], %298 {strides = array<i32>} : memref<16x32xf32, #tpu.memory_space<vmem>>, vector<8x16xf32>,
    %c0_120 = arith.constant 0 : index
    %c0_121 = arith.constant 0 : index
    %300 = vector.load %arg5[%c0_120, %c0_121] : memref<16x32xf32, #tpu.memory_space<vmem>>, vector<16x32xf32>
    %c408 = arith.constant 408 : index
    %c0_122 = arith.constant 0 : index
    %301 = vector.load %arg3[%c408, %c0_122] : memref<560x128xf32, #tpu.memory_space<vmem>>, vector<32x32xf32>
    %cst_123 = arith.constant dense<0.000000e+00> : vector<16x32xf32>
    %302 = tpu.matmul %300, %301, %cst_123 {dimension_numbers = #tpu.dot_dimension_numbers<[1], [0], [0], [1], [0, 0, 1, 1], [], []>} : vector<16x32xf32>, vector<32x32xf32>, vector<16x32xf32> -> vector<16x32xf32>
    %c440 = arith.constant 440 : index
    %c0_124 = arith.constant 0 : index
    %303 = vector.load %arg3[%c440, %c0_124] : memref<560x128xf32, #tpu.memory_space<vmem>>, vector<1x32xf32>
    %304 = vector.broadcast %303 : vector<1x32xf32> to vector<16x32xf32>
    %305 = arith.addf %302, %304 : vector<16x32xf32>
    %306 = arith.addf %206, %305 : vector<16x32xf32>
    %c553 = arith.constant 553 : index
    %c0_125 = arith.constant 0 : index
    %307 = vector.load %arg3[%c553, %c0_125] : memref<560x128xf32, #tpu.memory_space<vmem>>, vector<1x32xf32>
    %c554 = arith.constant 554 : index
    %c0_126 = arith.constant 0 : index
    %308 = vector.load %arg3[%c554, %c0_126] : memref<560x128xf32, #tpu.memory_space<vmem>>, vector<1x32xf32>
    %cst_127 = arith.constant dense<0.000000e+00> : vector<16xf32>
    %309 = vector.multi_reduction <add>, %306, %cst_127 [1] : vector<16x32xf32> to vector<16xf32>
    %310 = vector.shape_cast %309 : vector<16xf32> to vector<16x1xf32>
    %cst_128 = arith.constant 3.200000e+01 : f32
    %311 = vector.broadcast %cst_128 : f32 to vector<16x1xf32>
    %312 = arith.divf %310, %311 : vector<16x1xf32>
    %313 = vector.broadcast %312 : vector<16x1xf32> to vector<16x32xf32>
    %314 = arith.subf %306, %313 : vector<16x32xf32>
    %315 = arith.mulf %314, %314 : vector<16x32xf32>
    %cst_129 = arith.constant dense<0.000000e+00> : vector<16xf32>
    %316 = vector.multi_reduction <add>, %315, %cst_129 [1] : vector<16x32xf32> to vector<16xf32>
    %317 = vector.shape_cast %316 : vector<16xf32> to vector<16x1xf32>
    %cst_130 = arith.constant 3.200000e+01 : f32
    %318 = vector.broadcast %cst_130 : f32 to vector<16x1xf32>
    %319 = arith.divf %317, %318 : vector<16x1xf32>
    %320 = vector.broadcast %312 : vector<16x1xf32> to vector<16x32xf32>
    %321 = arith.subf %306, %320 : vector<16x32xf32>
    %cst_131 = arith.constant 9.99999996E-13 : f32
    %322 = vector.broadcast %cst_131 : f32 to vector<16x1xf32>
    %323 = arith.addf %319, %322 : vector<16x1xf32>
    %324 = math.rsqrt %323 : vector<16x1xf32>
    %325 = vector.broadcast %324 : vector<16x1xf32> to vector<16x32xf32>
    %326 = arith.mulf %321, %325 : vector<16x32xf32>
    %327 = vector.broadcast %307 : vector<1x32xf32> to vector<16x32xf32>
    %328 = arith.mulf %326, %327 : vector<16x32xf32>
    %329 = vector.broadcast %308 : vector<1x32xf32> to vector<16x32xf32>
    %330 = arith.addf %328, %329 : vector<16x32xf32>
    %c448 = arith.constant 448 : index
    %c0_132 = arith.constant 0 : index
    %331 = vector.load %arg3[%c448, %c0_132] : memref<560x128xf32, #tpu.memory_space<vmem>>, vector<32x64xf32>
    %cst_133 = arith.constant dense<0.000000e+00> : vector<16x64xf32>
    %332 = tpu.matmul %330, %331, %cst_133 {dimension_numbers = #tpu.dot_dimension_numbers<[1], [0], [0], [1], [0, 0, 1, 1], [], []>} : vector<16x32xf32>, vector<32x64xf32>, vector<16x64xf32> -> vector<16x64xf32>
    %c480 = arith.constant 480 : index
    %c0_134 = arith.constant 0 : index
    %333 = vector.load %arg3[%c480, %c0_134] : memref<560x128xf32, #tpu.memory_space<vmem>>, vector<1x64xf32>
    %334 = vector.broadcast %333 : vector<1x64xf32> to vector<16x64xf32>
    %335 = arith.addf %332, %334 : vector<16x64xf32>
    %cst_135 = arith.constant 5.000000e-01 : f32
    %336 = vector.broadcast %cst_135 : f32 to vector<16x64xf32>
    %337 = arith.mulf %336, %335 : vector<16x64xf32>
    %cst_136 = arith.constant 4.471500e-02 : f32
    %338 = vector.broadcast %cst_136 : f32 to vector<16x64xf32>
    %339 = arith.mulf %338, %335 : vector<16x64xf32>
    %340 = arith.mulf %339, %335 : vector<16x64xf32>
    %341 = arith.mulf %340, %335 : vector<16x64xf32>
    %342 = arith.addf %335, %341 : vector<16x64xf32>
    %cst_137 = arith.constant 0.797884583 : f32
    %343 = vector.broadcast %cst_137 : f32 to vector<16x64xf32>
    %344 = arith.mulf %343, %342 : vector<16x64xf32>
    %345 = math.tanh %344 : vector<16x64xf32>
    %cst_138 = arith.constant 1.000000e+00 : f32
    %346 = vector.broadcast %cst_138 : f32 to vector<16x64xf32>
    %347 = arith.addf %346, %345 : vector<16x64xf32>
    %348 = arith.mulf %337, %347 : vector<16x64xf32>
    %c488 = arith.constant 488 : index
    %c0_139 = arith.constant 0 : index
    %349 = vector.load %arg3[%c488, %c0_139] : memref<560x128xf32, #tpu.memory_space<vmem>>, vector<64x32xf32>
    %cst_140 = arith.constant dense<0.000000e+00> : vector<16x32xf32>
    %350 = tpu.matmul %348, %349, %cst_140 {dimension_numbers = #tpu.dot_dimension_numbers<[1], [0], [0], [1], [0, 0, 1, 1], [], []>} : vector<16x64xf32>, vector<64x32xf32>, vector<16x32xf32> -> vector<16x32xf32>
    %c552 = arith.constant 552 : index
    %c0_141 = arith.constant 0 : index
    %351 = vector.load %arg3[%c552, %c0_141] : memref<560x128xf32, #tpu.memory_space<vmem>>, vector<1x32xf32>
    %352 = vector.broadcast %351 : vector<1x32xf32> to vector<16x32xf32>
    %353 = arith.addf %350, %352 : vector<16x32xf32>
    %354 = arith.addf %330, %353 : vector<16x32xf32>
    %c555 = arith.constant 555 : index
    %c0_142 = arith.constant 0 : index
    %355 = vector.load %arg3[%c555, %c0_142] : memref<560x128xf32, #tpu.memory_space<vmem>>, vector<1x32xf32>
    %c556 = arith.constant 556 : index
    %c0_143 = arith.constant 0 : index
    %356 = vector.load %arg3[%c556, %c0_143] : memref<560x128xf32, #tpu.memory_space<vmem>>, vector<1x32xf32>
    %cst_144 = arith.constant dense<0.000000e+00> : vector<16xf32>
    %357 = vector.multi_reduction <add>, %354, %cst_144 [1] : vector<16x32xf32> to vector<16xf32>
    %358 = vector.shape_cast %357 : vector<16xf32> to vector<16x1xf32>
    %cst_145 = arith.constant 3.200000e+01 : f32
    %359 = vector.broadcast %cst_145 : f32 to vector<16x1xf32>
    %360 = arith.divf %358, %359 : vector<16x1xf32>
    %361 = vector.broadcast %360 : vector<16x1xf32> to vector<16x32xf32>
    %362 = arith.subf %354, %361 : vector<16x32xf32>
    %363 = arith.mulf %362, %362 : vector<16x32xf32>
    %cst_146 = arith.constant dense<0.000000e+00> : vector<16xf32>
    %364 = vector.multi_reduction <add>, %363, %cst_146 [1] : vector<16x32xf32> to vector<16xf32>
    %365 = vector.shape_cast %364 : vector<16xf32> to vector<16x1xf32>
    %cst_147 = arith.constant 3.200000e+01 : f32
    %366 = vector.broadcast %cst_147 : f32 to vector<16x1xf32>
    %367 = arith.divf %365, %366 : vector<16x1xf32>
    %368 = vector.broadcast %360 : vector<16x1xf32> to vector<16x32xf32>
    %369 = arith.subf %354, %368 : vector<16x32xf32>
    %cst_148 = arith.constant 9.99999996E-13 : f32
    %370 = vector.broadcast %cst_148 : f32 to vector<16x1xf32>
    %371 = arith.addf %367, %370 : vector<16x1xf32>
    %372 = math.rsqrt %371 : vector<16x1xf32>
    %373 = vector.broadcast %372 : vector<16x1xf32> to vector<16x32xf32>
    %374 = arith.mulf %369, %373 : vector<16x32xf32>
    %375 = vector.broadcast %355 : vector<1x32xf32> to vector<16x32xf32>
    %376 = arith.mulf %374, %375 : vector<16x32xf32>
    %377 = vector.broadcast %356 : vector<1x32xf32> to vector<16x32xf32>
    %378 = arith.addf %376, %377 : vector<16x32xf32>
    %379 = vector.extract_strided_slice %378 {offsets = [0, 0], sizes = [1, 32], strides = [1, 1]} : vector<16x32xf32> to vector<1x32xf32>
    %380 = vector.extract_strided_slice %378 {offsets = [8, 0], sizes = [1, 32], strides = [1, 1]} : vector<16x32xf32> to vector<1x32xf32>
    %381 = tpu.concatenate %379, %380 in 0 : vector<1x32xf32>, vector<1x32xf32> -> vector<2x32xf32>
    %c8_149 = arith.constant 8 : index
    %c0_150 = arith.constant 0 : index
    %382 = vector.load %arg3[%c8_149, %c0_150] : memref<560x128xf32, #tpu.memory_space<vmem>>, vector<32x128xf32>
    %cst_151 = arith.constant dense<0.000000e+00> : vector<2x128xf32>
    %383 = tpu.matmul %381, %382, %cst_151 {dimension_numbers = #tpu.dot_dimension_numbers<[1], [0], [0], [1], [0, 0, 1, 1], [], []>} : vector<2x32xf32>, vector<32x128xf32>, vector<2x128xf32> -> vector<2x128xf32>
    %c2 = arith.constant 2 : index
    %c0_152 = arith.constant 0 : index
    %384 = vector.load %arg3[%c2, %c0_152] : memref<560x128xf32, #tpu.memory_space<vmem>>, vector<1x128xf32>
    %385 = vector.broadcast %384 : vector<1x128xf32> to vector<2x128xf32>
    %386 = arith.addf %383, %385 : vector<2x128xf32>
    %387 = vector.shape_cast %386 : vector<2x128xf32> to vector<2x1x128xf32>
    %c0_153 = arith.constant 0 : index
    %c0_154 = arith.constant 0 : index
    %c0_155 = arith.constant 0 : index
    %388 = vector.load %arg4[%c0_153, %c0_154, %c0_155] : memref<2x1x128xf32, #tpu.memory_space<vmem>>, vector<2x1x128xf32>
    tpu.vector_store %arg4[%c0_153, %c0_154, %c0_155], %387 {strides = array<i32>} : memref<2x1x128xf32, #tpu.memory_space<vmem>>, vector<2x1x128xf32>,
    return
  }
  func.func @transform_0(%arg0: i32) -> (i32, i32) {
    %c0_i32 = arith.constant 0 : i32
    %c0_i32_0 = arith.constant 0 : i32
    return %arg0, %c0_i32 : i32, i32
  }
  func.func @transform_1(%arg0: i32) -> (i32, i32, i32) {
    %c0_i32 = arith.constant 0 : i32
    %c0_i32_0 = arith.constant 0 : i32
    %c0_i32_1 = arith.constant 0 : i32
    return %arg0, %c0_i32, %c0_i32_0 : i32, i32, i32
  }
  func.func @transform_2(%arg0: i32) -> (i32, i32) {
    %c0_i32 = arith.constant 0 : i32
    %c0_i32_0 = arith.constant 0 : i32
    %c0_i32_1 = arith.constant 0 : i32
    return %c0_i32, %c0_i32_0 : i32, i32
  }
  func.func @transform_3(%arg0: i32) -> (i32, i32, i32) {
    %c0_i32 = arith.constant 0 : i32
    %c0_i32_0 = arith.constant 0 : i32
    %c0_i32_1 = arith.constant 0 : i32
    return %arg0, %c0_i32, %c0_i32_0 : i32, i32, i32
  }
}

</mosaic_0001>

<bundles_post_ra>
// kernel: full_model_forward.1
= control target key start
LH: loop header
LB: loop body
LE: loop exit
PB: predicated region body
PF: predicated region fallthrough
CT: control target
= control target key end

     0   :  { %8 = vsyncpa [#allocation4], 0  ;;  %s3580_s0 = inlined_call_operand.vmem [shape: s32[16,1], index: 0, kind: input, shape index: {}]   ;;  %s3581_s1 = inlined_call_operand.vmem [shape: f32[2,1,8], index: 1, kind: input, shape index: {}]   ;;  %s3582_s2 = inlined_call_operand.hbm [shape: f32[560,128], index: 2, kind: input, shape index: {}]   ;;  %s3583_s3 = inlined_call_operand.hbm [shape: f32[2,1,128], index: 3, kind: output, shape index: {}]  }
   0x1   :  { %9 = vsyncpa [#allocation5], 0  ;;  %s3287_s12 = smov [#allocation3]   ;;  %s3239_s16 = scalar_lea.hbm %s3582_s2, 8960 }
   0x2   :  { %s19_s13 = sshll.u32 %s3287_s12, 4  ;;  %p3240_p0 = scmp.ne.s32.totalorder %s3582_s2, %s3239_s16  ;;  %s20_s13 = int_to_ptr.vmem [resolvable:$true] %s19_s13 }
   0x3   :  { %p3243_p1 = scmp.lt.u32.totalorder %s3239_s16, %s3582_s2 }
   0x5   :  { %p3245_p2 = pnand %p3243_p1, %p3240_p0 }
   0x7   :  { %3248 = shalt.err (!%p3245_p2)
}
   0x8   :  { %s3249_s21 = scalar_lea.vmem %s20_s13, 8960  ;;  %p3254_p4 = scmp.lt.s32.totalorder %s20_s13, %s20_s13 }
   0x9   :  { %p3250_p3 = scmp.ne.s32.totalorder %s20_s13, %s3249_s21  ;;  %p3255_p5 = scmp.lt.s32.totalorder %s3249_s21, %s3249_s21 }
   0xb   :  { %p3256_p6 = por %p3255_p5, %p3254_p4 }
   0xd   :  { %p3257_p7 = pnand %p3256_p6, %p3250_p3 }
   0xf   :  { %3260 = shalt.err (!%p3257_p7)
}
  0x10   :  { %s3288_s22 = smov 128   ;;  %s3289_s23 = smov 8  }
  0x11   :  { %25 = dma.hbm_to_vmem [thread:$0]  %s3582_s2, 8960, %s20_s13, [#allocation4], %s3288_s22, %s3288_s22, %s3289_s23  }
  0x12   :  { %3283 = dma.done.wait [#allocation4], 8960  }
  0x13   :  { %3284 = vsyncadd [#allocation4], 4294958336  ;;  %v3290_v0 = vmov 0   ;;  %v29_v1 = vld [vmem:[%s3580_s0] sm:$0xff]  ;;  %v45_v2 = vld [vmem:[#allocation3 + $0x48] sm:$0xff]  ;;  %vm66_vm0 = vcmask 1043456   ;;  %v31_v23 = vlaneseq }
  0x14   :  { %3178 = vset.pattern.permute.xlu0 %v3290_v0  ;;  %v46_v3 = vld [vmem:[#allocation3 + $0x50] sm:$0xff]  ;;  %v47_v4 = vld [vmem:[#allocation3 + $0x58] sm:$0xff]  ;;  %v48_v5 = vld [vmem:[#allocation3 + $0x60] sm:$0xff]  ;;  %v3291_v22 = vmov 0.0   ;;  %vm59_vm1 = vcmask 818176   ;;  %vm147_vm4 = vcmask 261120  }
  0x15   :  { %34 = vperm.xlu0 %3178, %v29_v1   ;;  %v30_v6 = vld [vmem:[%s3580_s0 + $0x8] sm:$0xff]  ;;  %v3052_v7 = vpack.c.bf16 %v46_v3, %v45_v2  ;;  %v3056_v8 = vpack.c.bf16 %v48_v5, %v47_v4  ;;  %v49_v9 = vld [vmem:[#allocation3 + $0x68] sm:$0xff]  ;;  %v50_v10 = vld [vmem:[#allocation3 + $0x70] sm:$0xff]  ;;  %v32_v24 = vand.u32 127, %v31_v23  ;;  %vm3292_vm5 = vmmov 0   ;;  %s3293_s0 = smov 64  }
  0x16   :  { %v3060_v11 = vpack.c.bf16 %v50_v10, %v49_v9  ;;  %v51_v12 = vld [vmem:[#allocation3 + $0x78] sm:$0xff]  ;;  %v52_v13 = vld [vmem:[#allocation3 + $0x80] sm:$0xff]  ;;  %v53_v15 = vld [vmem:[#allocation3 + $0x88] sm:$0xff]  ;;  %s3294_s2 = smov 96   ;;  %vm283_vm6 = vcmask 130048   ;;  %vm366_vm7 = vcmask 64512  }
  0x17   :  { %3053 = vmatprep.subr.bf16.mxu0 %v3052_v7  ;;  %v3064_v14 = vpack.c.bf16 %v52_v13, %v51_v12  ;;  %v54_v16 = vld [vmem:[#allocation3 + $0x90] sm:$0xff]  ;;  %v55_v18 = vld [vmem:[#allocation3 + $0x98] sm:$0xff]  ;;  %v56_v19 = vld [vmem:[#allocation3 + $0xa0] sm:$0xff]  ;;  %v3376_v12 = vshrl.u32 %v31_v23, 7  ;;  %s3295_s5 = smov 112   ;;  %s3296_s6 = smov 80  }
  0x18   :  { %3055 = vmatpush3.bf16.msra.mxu0 %v3052_v7  ;;  %v3068_v17 = vpack.c.bf16 %v54_v16, %v53_v15  ;;  %v3072_v20 = vpack.c.bf16 %v56_v19, %v55_v18  ;;  %v57_v21 = vld [vmem:[#allocation3 + $0xa8] sm:$0xf]  ;;  %v187_v46 = vld [vmem:[#allocation3 + $0xb0] sm:$0xff]  ;;  %v188_v47 = vld [vmem:[#allocation3 + $0xb8] sm:$0xff]  ;;  %s3297_s7 = smov 48   ;;  %s3298_s10 = smov 16  }
  0x19   :  { %37 = vperm.xlu0 %3178, %v30_v6   ;;  %3057 = vmatprep.subr.bf16.mxu0 %v3056_v8  ;;  %v58_v29 = vld [vmem:[#allocation3 + $0x28] sm:$0xff]  ;;  %v189_v48 = vld [vmem:[#allocation3 + $0xc0] sm:$0xff]  ;;  %v3076_v49 = vpack.c.bf16 %v188_v47, %v187_v46  ;;  %v2658_v4 = vld [vmem:[#allocation3 + $0xd0] ss:$0 sm:$0xff]  ;;  %vm626_vm8 = vcmask 261248   ;;  %vm1232_vm9 = vcmask 523264  }
  0x1a   :  { %v190_v50 = vld [vmem:[#allocation3 + $0xc8] sm:$0xff]  ;;  %v2656_v59 = vld [vmem:[#allocation3] ss:$0 sm:$0xff]  ;;  %v2657_v61 = vld [vmem:[#allocation3 + $0x1] ss:$0 sm:$0xff]  ;;  %vm2523_vm10 = vcmask 1040384  }
  0x1b   :  { %v3080_v51 = vpack.c.bf16 %v190_v50, %v189_v48  ;;  %3077 = vmatprep.subr.bf16.mxu1 %v3076_v49 }
  0x1c   :  { %3059 = vmatpush3.bf16.msra.mxu0 %v3056_v8  ;;  %3079 = vmatpush3.bf16.msra.mxu1 %v3076_v49 }
  0x1d   :  { %3061 = vmatprep.subr.bf16.mxu0 %v3060_v11  ;;  %3081 = vmatprep.subr.bf16.mxu1 %v3080_v51 }
  0x20   :  { %3063 = vmatpush3.bf16.msra.mxu0 %v3060_v11  ;;  %3083 = vmatpush3.bf16.msra.mxu1 %v3080_v51  ;;  %v277_v11 = vld [vmem:[%s3581_s1] sm:$0x1] }
  0x21   :  { %3065 = vmatprep.subr.bf16.mxu0 %v3064_v14  ;;  %2873 = vmatprep.subr.mxu1 %v3291_v22  ;;  %v278_v13 = vsub.f32 1.0, %v277_v11 }
  0x23   :  { %v279_v15 = vmul.f32 -1e+09, %v278_v13 }
  0x24   :  { %3067 = vmatpush3.bf16.msra.mxu0 %v3064_v14  ;;  %v3379_v14 = vsub.s32 0, %v3376_v12 }
  0x25   :  { %3069 = vmatprep.subr.bf16.mxu0 %v3068_v17 }
  0x26   :  { %v363_v16 = vrot.slane %v279_v15, %v3379_v14 }
  0x28   :  { %3071 = vmatpush3.bf16.msra.mxu0 %v3068_v17 }
  0x29   :  { %3073 = vmatprep.subr.bf16.mxu0 %v3072_v20 }
  0x2c   :  { %3075 = vmatpush3.bf16.msra.mxu0 %v3072_v20 }
  0x2d   :  { %2852 = vmatprep.subr.msk.mxu0 %vm66_vm0, %v57_v21 }
  0x30   :  { %2853 = vmatpush3.msk.msra.mxu0 %vm66_vm0, %v57_v21 }
  0x31   :  { %2868 = vmatprep.subr.mxu0 %v3291_v22 }
  0x94   :  { %v35_v25 = vpop.permute.xlu0 %34 }
  0x95   :  { %vm39_vm2 = vcmp.eq.s32.totalorder %v35_v25, %v32_v24 }
  0x96   :  { %v2651_v26 = vsel %vm39_vm2, 1.0, %v3291_v22 }
  0x97   :  { %2854 = vmatprep.mubr.msk.f32.mxu0 %vm59_vm1, %v2651_v26 }
  0x98   :  { %v38_v27 = vpop.permute.xlu0 %37 }
  0x99   :  { %vm40_vm3 = vcmp.eq.s32.totalorder %v38_v27, %v32_v24 }
  0x9a   :  { %v2652_v28 = vsel %vm40_vm3, 1.0, %v3291_v22 }
  0x9b   :  { %2855 = vmatmul.mubr.msk.f32.vlgmr.msra.gmra.mrb[0].mxu0 %vm59_vm1, %v2652_v28 }
  0x9c   :  { %2870 = vmatprep.mubr.msk.f32.mxu0 %vm3292_vm5, %v3291_v22 }
 0x16e   :  { %v2856_v30 = vpop.f32.mrb[0].mxu0 }
 0x16f   :  { %v136_v31 = vpop.f32.mrb[1].mxu0  ;;  %v142_v33 = vadd.f32 %v2856_v30, %v58_v29 }
 0x170   :  { %v137_v32 = vadd.f32 %v136_v31, %v58_v29 }
 0x171   :  { %v151_v35 = vsel %vm147_vm4, %v142_v33, 0.0 }
 0x172   :  { %v148_v34 = vsel %vm147_vm4, %v137_v32, 0.0 }
 0x173   :  { %149 = vadd.xlane.f32.xlu1 %v148_v34 }
 0x177   :  { %152 = vadd.xlane.f32.xlu1 %v151_v35 }
 0x200   :  { %v150_v36 = vpop.xlane.xlu1 %149 }
 0x201   :  { %v155_v37 = vmul.f32 0.03125, %v150_v36 }
 0x203   :  { %v157_v38 = vsub.f32 %v137_v32, %v155_v37 }
 0x204   :  { %v153_v39 = vpop.xlane.xlu1 %152 }
 0x205   :  { %v156_v40 = vmul.f32 0.03125, %v153_v39  ;;  %v159_v41 = vmul.f32 %v157_v38, %v157_v38 }
 0x207   :  { %v158_v42 = vsub.f32 %v142_v33, %v156_v40  ;;  %v161_v43 = vsel %vm147_vm4, %v159_v41, 0.0 }
 0x208   :  { %162 = vadd.xlane.f32.xlu0 %v161_v43 }
 0x209   :  { %v160_v44 = vmul.f32 %v158_v42, %v158_v42 }
 0x20b   :  { %v164_v45 = vsel %vm147_vm4, %v160_v44, 0.0 }
 0x20c   :  { %165 = vadd.xlane.f32.xlu1 %v164_v45 }
 0x295   :  { %v163_v52 = vpop.xlane.xlu0 %162 }
 0x296   :  { %v167_v53 = vmul.f32 0.03125, %v163_v52  ;;  %v2667_v52 = vld [vmem:[%s3581_s1 + $0x1] sm:$0x1] }
 0x298   :  { %v169_v54 = vadd.f32 1e-12, %v167_v53  ;;  %v630_v53 = vsub.f32 1.0, %v2667_v52 }
 0x299   :  { %v166_v55 = vpop.xlane.xlu1 %165 }
 0x29a   :  { %3179 = vrsqrt.f32 %v169_v54  ;;  %v168_v56 = vmul.f32 0.03125, %v166_v55  ;;  %v631_v54 = vmul.f32 -1e+09, %v630_v53 }
 0x29c   :  { %v170_v57 = vadd.f32 1e-12, %v168_v56 }
 0x29e   :  { %3181 = vrsqrt.f32 %v170_v57  ;;  %v714_v57 = vrot.slane %v631_v54, %v3379_v14 }
 0x2a4   :  { %v3180_v58 = vpop.eup %3179 }
 0x2a5   :  { %v173_v60 = vmul.f32 %v3180_v58, %v157_v38 }
 0x2a7   :  { %v179_v62 = vmul.f32 %v2656_v59, %v173_v60 }
 0x2a8   :  { %v3182_v63 = vpop.eup %3181 }
 0x2a9   :  { %v174_v0 = vmul.f32 %v3182_v63, %v158_v42  ;;  %v3350_v1 = vadd.f32 %v2657_v61, %v179_v62 }
 0x2ab   :  { %v180_v2 = vmul.f32 %v2656_v59, %v174_v0  ;;  %2865 = vmatprep.mubr.msk.f32.mxu1 %vm147_vm4, %v3350_v1 }
 0x2ad   :  { %v3354_v3 = vadd.f32 %v2657_v61, %v180_v2 }
 0x2af   :  { %2866 = vmatmul.mubr.msk.f32.vlgmr.msra.gmra.mrb[0].mxu1 %vm147_vm4, %v3354_v3 }
 0x2b0   :  { %2875 = vmatprep.mubr.msk.f32.mxu1 %vm3292_vm5, %v3291_v22 }
 0x382   :  { %v2867_v5 = vpop.f32.mrb[0].mxu1 }
 0x383   :  { %v3362_v6 = vadd.f32 %v2867_v5, %v2658_v4  ;;  %v268_v7 = vpop.f32.mrb[1].mxu1 }
 0x384   :  { %v269_v8 = vadd.f32 %v2658_v4, %v268_v7 }
 0x386   :  { %378 = vrot.lane.b32.xlu0 %v269_v8, %s3293_s0  ;;  %281 = vrot.lane.b32.xlu1 %v269_v8, %s3294_s2 }
 0x3f8   :  { %v379_v9 = vpop.permute.xlu0 %378  ;;  %v282_v10 = vpop.permute.xlu1 %281 }
 0x3f9   :  { %2869 = vmatpush3.xpose.msk.msra.mxu0 %vm283_vm6, %v282_v10  ;;  %2874 = vmatpush3.msra.mxu1 %v379_v9 }
 0x3fa   :  { %2878 = vmatprep.subr.mxu1 %v3291_v22  ;;  %2893 = vmatprep.subr.mxu0 %v3291_v22 }
 0x3fc   :  { %2871 = vmatmul.mubr.msk.f32.vlgmr.msra.gmra.mrb[2].mxu0 %vm283_vm6, %v269_v8 }
 0x3fd   :  { %2895 = vmatprep.mubr.msk.f32.mxu0 %vm3292_vm5, %v3291_v22 }
 0x4cf   :  { %v354_v17 = vpop.f32.mrb[2].mxu0 }
 0x4d0   :  { %v358_v18 = vmul.f32 0.25, %v354_v17  ;;  %v2872_v19 = vpop.f32.mrb[3].mxu0 }
 0x4d2   :  { %v365_v20 = vadd.f32 %v363_v16, %v358_v18 }
 0x4d4   :  { %v367_v21 = vsel %vm366_vm7, %v365_v20, -inf }
 0x4d5   :  { %368 = vmax.xlane.f32.xlu1 %v367_v21 }
 0x4e6   :  { %455 = vrot.lane.b32.xlu1 %v269_v8, %s3295_s5 }
 0x562   :  { %v369_v23 = vpop.xlane.xlu1 %368 }
 0x563   :  { %v370_v24 = vsub.f32 %v365_v20, %v369_v23 }
 0x565   :  { %v371_v25 = vmul.f32 1.442695, %v370_v24 }
 0x566   :  { %v456_v32 = vpop.permute.xlu1 %455 }
 0x567   :  { %3183 = vpow2.f32 %v371_v25 }
 0x571   :  { %v3184_v26 = vpop.eup %3183 }
 0x572   :  { %v373_v27 = vsel %vm366_vm7, %v3184_v26, 0.0 }
 0x573   :  { %374 = vadd.xlane.f32.xlu0 %v373_v27 }
 0x589   :  { %457 = vrot.lane.b32.xlu0 %v269_v8, %s3296_s6 }
 0x600   :  { %v375_v28 = vpop.xlane.xlu0 %374 }
 0x601   :  { %3185 = vrcp.f32 %v375_v28 }
 0x604   :  { %v458_v31 = vpop.permute.xlu0 %457 }
 0x60b   :  { %v3186_v29 = vpop.eup %3185 }
 0x60c   :  { %v377_v30 = vmul.f32 %v3186_v29, %v3184_v26 }
 0x60e   :  { %2876 = vmatmul.mubr.msk.f32.vlgmr.msra.gmra.mrb[2].mxu1 %vm366_vm7, %v377_v30  ;;  %v980_v30 = vld [vmem:[#allocation3 + $0xe0] sm:$0xff] }
 0x60f   :  { %2879 = vmatpush3.xpose.msk.msra.mxu1 %vm283_vm6, %v458_v31  ;;  %2880 = vmatprep.mubr.msk.f32.mxu1 %vm3292_vm5, %v3291_v22 }
 0x610   :  { %2883 = vmatprep.subr.mxu1 %v3291_v22 }
 0x612   :  { %2881 = vmatmul.mubr.msk.f32.vlgmr.msra.gmra.mrb[4].mxu1 %vm283_vm6, %v456_v32  ;;  %v981_v32 = vld [vmem:[#allocation3 + $0xe8] sm:$0xff] }
 0x613   :  { %2885 = vmatprep.mubr.msk.f32.mxu1 %vm3292_vm5, %v3291_v22 }
 0x6e1   :  { %v450_v33 = vpop.f32.mrb[2].mxu1 }
 0x6e2   :  { %454 = vst.msk [vmem:[#allocation2] sm:$0xff] %vm283_vm6, %v450_v33  ;;  %v2877_v34 = vpop.f32.mrb[3].mxu1  ;;  %v982_v33 = vld [vmem:[#allocation3 + $0xf0] sm:$0xff] }
 0x6e3   :  { %v3088_v34 = vpack.c.bf16 %v982_v33, %v981_v32  ;;  %v2679_v33 = vld [vmem:[#allocation3 + $0x120] ss:$0 sm:$0xff] }
 0x6e5   :  { %v529_v35 = vpop.f32.mrb[4].mxu1 }
 0x6e6   :  { %v533_v36 = vmul.f32 0.25, %v529_v35  ;;  %v2882_v37 = vpop.f32.mrb[5].mxu1 }
 0x6e8   :  { %v534_v38 = vadd.f32 %v533_v36, %v363_v16 }
 0x6ea   :  { %v535_v39 = vsel %vm366_vm7, %v534_v38, -inf }
 0x6eb   :  { %536 = vmax.xlane.f32.xlu0 %v535_v39 }
 0x701   :  { %546 = vrot.lane.b32.xlu0 %v269_v8, %s3297_s7 }
 0x705   :  { %807 = vrot.lane.b32.xlu0 %v3362_v6, %s3296_s6 }
 0x709   :  { %805 = vrot.lane.b32.xlu0 %v3362_v6, %s3295_s5 }
 0x778   :  { %v537_v40 = vpop.xlane.xlu0 %536 }
 0x779   :  { %v538_v41 = vsub.f32 %v534_v38, %v537_v40 }
 0x77b   :  { %v539_v42 = vmul.f32 1.442695, %v538_v41  ;;  %v2674_v41 = vld [vmem:[#allocation3 + $0xf8] ss:$0 sm:$0xff] }
 0x77c   :  { %v547_v43 = vpop.permute.xlu0 %546 }
 0x77d   :  { %3187 = vpow2.f32 %v539_v42  ;;  %2884 = vmatpush3.msra.mxu1 %v547_v43 }
 0x77e   :  { %2888 = vmatprep.subr.mxu1 %v3291_v22 }
 0x780   :  { %v808_v50 = vpop.permute.xlu0 %807 }
 0x784   :  { %v806_v51 = vpop.permute.xlu0 %805 }
 0x787   :  { %v3188_v44 = vpop.eup %3187 }
 0x788   :  { %v541_v45 = vsel %vm366_vm7, %v3188_v44, 0.0 }
 0x789   :  { %542 = vadd.xlane.f32.xlu1 %v541_v45 }
 0x79a   :  { %633 = vrot.lane.b32.xlu1 %v3362_v6, %s3294_s2 }
 0x816   :  { %v543_v46 = vpop.xlane.xlu1 %542 }
 0x817   :  { %3189 = vrcp.f32 %v543_v46 }
 0x81a   :  { %v634_v49 = vpop.permute.xlu1 %633 }
 0x821   :  { %v3190_v47 = vpop.eup %3189 }
 0x822   :  { %v545_v48 = vmul.f32 %v3190_v47, %v3188_v44 }
 0x824   :  { %2886 = vmatmul.mubr.msk.f32.vlgmr.msra.gmra.mrb[6].mxu1 %vm366_vm7, %v545_v48 }
 0x825   :  { %2889 = vmatpush3.xpose.msk.msra.mxu1 %vm283_vm6, %v634_v49  ;;  %2890 = vmatprep.mubr.msk.f32.mxu1 %vm3292_vm5, %v3291_v22 }
 0x826   :  { %2898 = vmatprep.subr.mxu1 %v3291_v22 }
 0x828   :  { %2891 = vmatmul.mubr.msk.f32.vlgmr.msra.gmra.mrb[8].mxu1 %vm283_vm6, %v3362_v6 }
 0x829   :  { %2899 = vmatpush3.xpose.msk.msra.mxu1 %vm283_vm6, %v808_v50  ;;  %2900 = vmatprep.mubr.msk.f32.mxu1 %vm3292_vm5, %v3291_v22 }
 0x82c   :  { %2901 = vmatmul.mubr.msk.f32.vlgmr.msra.gmra.mrb[10].mxu1 %vm283_vm6, %v806_v51 }
 0x8f7   :  { %v618_v55 = vpop.f32.mrb[6].mxu1 }
 0x8f8   :  { %v2887_v56 = vpop.f32.mrb[7].mxu1 }
 0x8fb   :  { %v705_v58 = vpop.f32.mrb[8].mxu1 }
 0x8fc   :  { %v709_v59 = vmul.f32 0.25, %v705_v58  ;;  %v2892_v60 = vpop.f32.mrb[9].mxu1 }
 0x8fe   :  { %v716_v61 = vadd.f32 %v714_v57, %v709_v59  ;;  %v1112_v59 = vld [vmem:[#allocation3 + $0x108] sm:$0xff] }
 0x8ff   :  { %v879_v62 = vpop.f32.mrb[10].mxu1 }
 0x900   :  { %v883_v63 = vmul.f32 0.25, %v879_v62  ;;  %v2902_v0 = vpop.f32.mrb[11].mxu1  ;;  %v717_v2 = vsel %vm366_vm7, %v716_v61, -inf  ;;  %v1114_v62 = vld [vmem:[#allocation3 + $0x118] sm:$0xff] }
 0x901   :  { %718 = vmax.xlane.f32.xlu0 %v717_v2 }
 0x902   :  { %v884_v4 = vadd.f32 %v883_v63, %v714_v57 }
 0x904   :  { %v885_v5 = vsel %vm366_vm7, %v884_v4, -inf }
 0x905   :  { %886 = vmax.xlane.f32.xlu1 %v885_v5 }
 0x916   :  { %896 = vrot.lane.b32.xlu1 %v3362_v6, %s3297_s7 }
 0x91a   :  { %623 = vrot.lane.b32.xlu1 %v618_v55, %s3298_s10 }
 0x98e   :  { %v719_v7 = vpop.xlane.xlu0 %718 }
 0x98f   :  { %v720_v8 = vsub.f32 %v716_v61, %v719_v7  ;;  %v1113_v61 = vld [vmem:[#allocation3 + $0x110] sm:$0xff] }
 0x990   :  { %v3096_v63 = vpack.c.bf16 %v1114_v62, %v1113_v61 }
 0x991   :  { %v721_v9 = vmul.f32 1.442695, %v720_v8 }
 0x992   :  { %v887_v10 = vpop.xlane.xlu1 %886 }
 0x993   :  { %3191 = vpow2.f32 %v721_v9  ;;  %v888_v11 = vsub.f32 %v884_v4, %v887_v10  ;;  %v2677_v10 = vld [vmem:[#allocation3 + $0x169] ss:$0 sm:$0xff] }
 0x995   :  { %v889_v13 = vmul.f32 1.442695, %v888_v11 }
 0x996   :  { %v897_v15 = vpop.permute.xlu1 %896 }
 0x997   :  { %3193 = vpow2.f32 %v889_v13 }
 0x99a   :  { %v624_v16 = vpop.permute.xlu1 %623 }
 0x99b   :  { %627 = vst.msk [vmem:[#allocation2] sm:$0xff] %vm626_vm8, %v624_v16  ;;  %v2678_v16 = vld [vmem:[#allocation3 + $0x16a] ss:$0 sm:$0xff] }
 0x99d   :  { %v3192_v17 = vpop.eup %3191 }
 0x99e   :  { %v723_v18 = vsel %vm366_vm7, %v3192_v17, 0.0 }
 0x99f   :  { %724 = vadd.xlane.f32.xlu0 %v723_v18 }
 0x9a1   :  { %v3194_v19 = vpop.eup %3193 }
 0x9a2   :  { %v891_v20 = vsel %vm366_vm7, %v3194_v19, 0.0  ;;  %v977_v21 = vld [vmem:[#allocation2] sm:$0xff] }
 0x9a3   :  { %892 = vadd.xlane.f32.xlu0 %v891_v20  ;;  %2916 = vmatprep.mubr.msk.f32.mxu1 %vm147_vm4, %v977_v21  ;;  %v1219_v21 = vld [vmem:[#allocation3 + $0x128] sm:$0xff] }
 0x9b9   :  { %728 = vrot.lane.b32.xlu0 %v3362_v6, %s3293_s0  ;;  %v979_v6 = vld [vmem:[#allocation3 + $0xd8] sm:$0xff] }
 0x9ba   :  { %v3084_v31 = vpack.c.bf16 %v980_v30, %v979_v6  ;;  %v1225_v30 = vld [vmem:[#allocation3 + $0x158] sm:$0xff] }
 0x9bc   :  { %3085 = vmatprep.subr.bf16.mxu1 %v3084_v31 }
 0x9bd   :  { %3087 = vmatpush3.bf16.msra.mxu1 %v3084_v31  ;;  %v1226_v31 = vld [vmem:[#allocation3 + $0x160] sm:$0xff] }
 0x9be   :  { %3089 = vmatprep.subr.bf16.mxu1 %v3088_v34  ;;  %v3112_v32 = vpack.c.bf16 %v1226_v31, %v1225_v30  ;;  %v2686_v31 = vld [vmem:[#allocation3 + $0x16c] ss:$0 sm:$0xff] }
 0x9c1   :  { %3091 = vmatpush3.bf16.msra.mxu1 %v3088_v34 }
 0xa2c   :  { %v725_v23 = vpop.xlane.xlu0 %724 }
 0xa2d   :  { %3195 = vrcp.f32 %v725_v23  ;;  %v1220_v23 = vld [vmem:[#allocation3 + $0x130] sm:$0xff] }
 0xa30   :  { %v893_v24 = vpop.xlane.xlu0 %892 }
 0xa31   :  { %3197 = vrcp.f32 %v893_v24  ;;  %v3100_v24 = vpack.c.bf16 %v1220_v23, %v1219_v21 }
 0xa33   :  { %3101 = vmatprep.subr.bf16.mxu1 %v3100_v24 }
 0xa34   :  { %v729_v25 = vpop.permute.xlu0 %728 }
 0xa35   :  { %2894 = vmatpush3.msra.mxu0 %v729_v25  ;;  %v1221_v25 = vld [vmem:[#allocation3 + $0x138] sm:$0xff] }
 0xa36   :  { %2903 = vmatprep.subr.mxu0 %v3291_v22 }
 0xa37   :  { %v3196_v26 = vpop.eup %3195 }
 0xa38   :  { %v727_v27 = vmul.f32 %v3196_v26, %v3192_v17  ;;  %v1222_v26 = vld [vmem:[#allocation3 + $0x140] sm:$0xff] }
 0xa3a   :  { %2896 = vmatmul.mubr.msk.f32.vlgmr.msra.gmra.mrb[4].mxu0 %vm366_vm7, %v727_v27  ;;  %v3104_v27 = vpack.c.bf16 %v1222_v26, %v1221_v25 }
 0xa3b   :  { %v3198_v28 = vpop.eup %3197  ;;  %2904 = vmatpush3.msra.mxu0 %v897_v15  ;;  %2905 = vmatprep.mubr.msk.f32.mxu0 %vm3292_vm5, %v3291_v22 }
 0xa3c   :  { %v895_v29 = vmul.f32 %v3198_v28, %v3194_v19  ;;  %v1223_v28 = vld [vmem:[#allocation3 + $0x148] sm:$0xff] }
 0xa3e   :  { %2906 = vmatmul.mubr.msk.f32.vlgmr.msra.gmra.mrb[6].mxu0 %vm366_vm7, %v895_v29  ;;  %v1224_v29 = vld [vmem:[#allocation3 + $0x150] sm:$0xff] }
 0xa3f   :  { %v3108_v6 = vpack.c.bf16 %v1224_v29, %v1223_v28  ;;  %v2685_v28 = vld [vmem:[#allocation3 + $0x16b] ss:$0 sm:$0xff] }
 0xb0d   :  { %v800_v35 = vpop.f32.mrb[4].mxu0 }
 0xb0e   :  { %804 = vst.msk [vmem:[#allocation2 + $0x8] sm:$0xff] %vm283_vm6, %v800_v35  ;;  %v2897_v36 = vpop.f32.mrb[5].mxu0 }
 0xb11   :  { %v968_v37 = vpop.f32.mrb[6].mxu0 }
 0xb12   :  { %973 = vrot.lane.b32.xlu0 %v968_v37, %s3298_s10  ;;  %v2907_v38 = vpop.f32.mrb[7].mxu0 }
 0xb84   :  { %v974_v39 = vpop.permute.xlu0 %973 }
 0xb85   :  { %976 = vst.msk [vmem:[#allocation2 + $0x8] sm:$0xff] %vm626_vm8, %v974_v39 }
 0xb8c   :  { %v978_v40 = vld [vmem:[#allocation2 + $0x8] sm:$0xff] }
 0xb8d   :  { %2917 = vmatmul.mubr.msk.f32.vlgmr.msra.gmra.mrb[12].mxu1 %vm147_vm4, %v978_v40 }
 0xb8e   :  { %3103 = vmatpush3.bf16.msra.mxu1 %v3100_v24 }
 0xb8f   :  { %3105 = vmatprep.subr.bf16.mxu1 %v3104_v27 }
 0xb92   :  { %3107 = vmatpush3.bf16.msra.mxu1 %v3104_v27 }
 0xb93   :  { %3109 = vmatprep.subr.bf16.mxu1 %v3108_v6 }
 0xb96   :  { %3111 = vmatpush3.bf16.msra.mxu1 %v3108_v6 }
 0xb97   :  { %3113 = vmatprep.subr.bf16.mxu1 %v3112_v32 }
 0xb9a   :  { %3115 = vmatpush3.bf16.msra.mxu1 %v3112_v32 }
 0xb9b   :  { %2970 = vmatprep.subr.mxu1 %v3291_v22 }
 0xc60   :  { %v2918_v42 = vpop.f32.mrb[12].mxu1 }
 0xc61   :  { %v1066_v43 = vadd.f32 %v2918_v42, %v2674_v41  ;;  %v1060_v44 = vpop.f32.mrb[13].mxu1 }
 0xc62   :  { %v1061_v45 = vadd.f32 %v2674_v41, %v1060_v44 }
 0xc63   :  { %v1070_v46 = vadd.f32 %v1066_v43, %v3354_v3 }
 0xc64   :  { %v1069_v47 = vadd.f32 %v1061_v45, %v3350_v1  ;;  %v1111_v1 = vld [vmem:[#allocation3 + $0x100] sm:$0xff] }
 0xc65   :  { %v1076_v48 = vsel %vm147_vm4, %v1070_v46, 0.0  ;;  %v3092_v60 = vpack.c.bf16 %v1112_v59, %v1111_v1 }
 0xc66   :  { %1077 = vadd.xlane.f32.xlu0 %v1076_v48  ;;  %v1073_v49 = vsel %vm147_vm4, %v1069_v47, 0.0 }
 0xc67   :  { %1074 = vadd.xlane.f32.xlu1 %v1073_v49  ;;  %3093 = vmatprep.subr.bf16.mxu0 %v3092_v60 }
 0xc68   :  { %3095 = vmatpush3.bf16.msra.mxu0 %v3092_v60 }
 0xc69   :  { %3097 = vmatprep.subr.bf16.mxu0 %v3096_v63 }
 0xc6c   :  { %3099 = vmatpush3.bf16.msra.mxu0 %v3096_v63 }
 0xcf3   :  { %v1078_v50 = vpop.xlane.xlu0 %1077 }
 0xcf4   :  { %v1080_v51 = vmul.f32 0.03125, %v1078_v50  ;;  %v1075_v52 = vpop.xlane.xlu1 %1074 }
 0xcf5   :  { %v1079_v53 = vmul.f32 0.03125, %v1075_v52 }
 0xcf6   :  { %v1082_v54 = vsub.f32 %v1070_v46, %v1080_v51 }
 0xcf7   :  { %v1081_v55 = vsub.f32 %v1069_v47, %v1079_v53 }
 0xcf8   :  { %v1084_v56 = vmul.f32 %v1082_v54, %v1082_v54 }
 0xcf9   :  { %v1083_v57 = vmul.f32 %v1081_v55, %v1081_v55 }
 0xcfa   :  { %v1088_v58 = vsel %vm147_vm4, %v1084_v56, 0.0  ;;  %v2682_v56 = vld [vmem:[#allocation3 + $0x168] ss:$0 sm:$0xff] }
 0xcfb   :  { %1089 = vadd.xlane.f32.xlu1 %v1088_v58  ;;  %v1085_v3 = vsel %vm147_vm4, %v1083_v57, 0.0 }
 0xcfc   :  { %1086 = vadd.xlane.f32.xlu0 %v1085_v3 }
 0xd88   :  { %v1090_v0 = vpop.xlane.xlu1 %1089 }
 0xd89   :  { %v1092_v2 = vmul.f32 0.03125, %v1090_v0  ;;  %v1087_v4 = vpop.xlane.xlu0 %1086 }
 0xd8a   :  { %v1091_v5 = vmul.f32 0.03125, %v1087_v4 }
 0xd8b   :  { %v1094_v7 = vadd.f32 1e-12, %v1092_v2 }
 0xd8c   :  { %v1093_v8 = vadd.f32 1e-12, %v1091_v5 }
 0xd8d   :  { %3199 = vrsqrt.f32 %v1094_v7 }
 0xd8e   :  { %3201 = vrsqrt.f32 %v1093_v8 }
 0xd97   :  { %v3200_v9 = vpop.eup %3199 }
 0xd98   :  { %v3202_v11 = vpop.eup %3201  ;;  %v1098_v13 = vmul.f32 %v3200_v9, %v1082_v54 }
 0xd99   :  { %v1097_v15 = vmul.f32 %v3202_v11, %v1081_v55 }
 0xd9a   :  { %v1104_v17 = vmul.f32 %v2677_v10, %v1098_v13  ;;  %v1356_v13 = vld [vmem:[#allocation3 + $0x170] sm:$0xff] }
 0xd9b   :  { %v1103_v18 = vmul.f32 %v2677_v10, %v1097_v15  ;;  %v1357_v15 = vld [vmem:[#allocation3 + $0x178] sm:$0xff] }
 0xd9c   :  { %v1110_v20 = vadd.f32 %v2678_v16, %v1104_v17  ;;  %v1358_v17 = vld [vmem:[#allocation3 + $0x180] sm:$0xff] }
 0xd9d   :  { %v1109_v19 = vadd.f32 %v2678_v16, %v1103_v18  ;;  %v3116_v16 = vpack.c.bf16 %v1357_v15, %v1356_v13  ;;  %v1359_v18 = vld [vmem:[#allocation3 + $0x188] sm:$0xff] }
 0xd9f   :  { %2927 = vmatprep.mubr.msk.f32.mxu0 %vm147_vm4, %v1109_v19  ;;  %3117 = vmatprep.subr.bf16.mxu0 %v3116_v16 }
 0xda0   :  { %2928 = vmatmul.mubr.msk.f32.vlgmr.msra.gmra.mrb[8].mxu0 %vm147_vm4, %v1110_v20 }
 0xda1   :  { %3119 = vmatpush3.bf16.msra.mxu0 %v3116_v16 }
 0xe73   :  { %v2929_v34 = vpop.f32.mrb[8].mxu0 }
 0xe74   :  { %v1198_v35 = vadd.f32 %v2929_v34, %v2679_v33  ;;  %v1192_v36 = vpop.f32.mrb[9].mxu0 }
 0xe75   :  { %v1193_v37 = vadd.f32 %v2679_v33, %v1192_v36  ;;  %v2687_v36 = vld [vmem:[#allocation3 + $0x190] ss:$0 sm:$0xff] }
 0xe76   :  { %v1204_v38 = vmul.f32 0.044715, %v1198_v35  ;;  %v1202_v53 = vmul.f32 0.5, %v1198_v35 }
 0xe77   :  { %v1203_v39 = vmul.f32 0.044715, %v1193_v37  ;;  %v1201_v51 = vmul.f32 0.5, %v1193_v37 }
 0xe78   :  { %v1206_v40 = vmul.f32 %v1204_v38, %v1198_v35 }
 0xe79   :  { %v1205_v41 = vmul.f32 %v1203_v39, %v1193_v37 }
 0xe7a   :  { %v1208_v42 = vmul.f32 %v1206_v40, %v1198_v35 }
 0xe7b   :  { %v1207_v43 = vmul.f32 %v1205_v41, %v1193_v37 }
 0xe7c   :  { %v1210_v44 = vadd.f32 %v1208_v42, %v1198_v35 }
 0xe7d   :  { %v1209_v45 = vadd.f32 %v1207_v43, %v1193_v37 }
 0xe7e   :  { %v1212_v46 = vmul.f32 0.7978846, %v1210_v44 }
 0xe7f   :  { %v1211_v47 = vmul.f32 0.7978846, %v1209_v45 }
 0xe80   :  { %3203 = vtanh.f32 %v1212_v46 }
 0xe81   :  { %3205 = vtanh.f32 %v1211_v47  ;;  %v1446_v47 = vld [vmem:[%s3581_s1] sm:$0x1] }
 0xe8a   :  { %v3204_v48 = vpop.eup %3203 }
 0xe8b   :  { %v3206_v49 = vpop.eup %3205  ;;  %v1216_v50 = vadd.f32 1.0, %v3204_v48  ;;  %v1447_v48 = vsub.f32 1.0, %v1446_v47 }
 0xe8c   :  { %v1215_v52 = vadd.f32 1.0, %v3206_v49  ;;  %v2696_v49 = vld [vmem:[%s3581_s1 + $0x1] sm:$0x1]  ;;  %s3301_s1 = smov [#allocation6]  }
 0xe8d   :  { %v1218_v55 = vmul.f32 %v1216_v50, %v1202_v53  ;;  %v1448_v50 = vmul.f32 -1e+09, %v1447_v48  ;;  %s2639_s15 = sshll.u32 %s3301_s1, 4  ;;  %s2640_s15 = int_to_ptr.vmem [resolvable:$true] %s2639_s15 }
 0xe8e   :  { %v1217_v54 = vmul.f32 %v1215_v52, %v1201_v51  ;;  %v1795_v51 = vsub.f32 1.0, %v2696_v49  ;;  %s3261_s16 = scalar_lea.vmem %s2640_s15, 32  ;;  %p3266_p9 = scmp.lt.s32.totalorder %s2640_s15, %s2640_s15 }
 0xe8f   :  { %v1531_v52 = vrot.slane %v1448_v50, %v3379_v14  ;;  %p3262_p8 = scmp.ne.s32.totalorder %s2640_s15, %s3261_s16  ;;  %p3267_p10 = scmp.lt.s32.totalorder %s3261_s16, %s3261_s16 }
 0xe90   :  { %2946 = vmatprep.mubr.msk.f32.mxu1 %vm1232_vm9, %v1217_v54  ;;  %v1796_v54 = vmul.f32 -1e+09, %v1795_v51 }
 0xe91   :  { %2947 = vmatmul.mubr.msk.f32.vlgmr.msra.gmra.mrb[14].mxu1 %vm1232_vm9, %v1218_v55  ;;  %p3268_p11 = por %p3267_p10, %p3266_p9 }
 0xe92   :  { %2972 = vmatprep.mubr.msk.f32.mxu1 %vm3292_vm5, %v3291_v22 }
 0xe93   :  { %p3269_p12 = pnand %p3268_p11, %p3262_p8 }
 0xf64   :  { %v2948_v57 = vpop.f32.mrb[14].mxu1 }
 0xf65   :  { %v1311_v58 = vadd.f32 %v2948_v57, %v2682_v56  ;;  %v1305_v3 = vpop.f32.mrb[15].mxu1 }
 0xf66   :  { %v1306_v1 = vadd.f32 %v2682_v56, %v1305_v3 }
 0xf67   :  { %v1315_v59 = vadd.f32 %v1311_v58, %v1110_v20 }
 0xf68   :  { %v1314_v60 = vadd.f32 %v1306_v1, %v1109_v19  ;;  %v3120_v19 = vpack.c.bf16 %v1359_v18, %v1358_v17 }
 0xf69   :  { %v1321_v61 = vsel %vm147_vm4, %v1315_v59, 0.0 }
 0xf6a   :  { %1322 = vadd.xlane.f32.xlu1 %v1321_v61  ;;  %v1318_v62 = vsel %vm147_vm4, %v1314_v60, 0.0  ;;  %3121 = vmatprep.subr.bf16.mxu0 %v3120_v19 }
 0xf6b   :  { %1319 = vadd.xlane.f32.xlu0 %v1318_v62  ;;  %3123 = vmatpush3.bf16.msra.mxu0 %v3120_v19 }
 0xf6c   :  { %2960 = vmatprep.subr.mxu0 %v3291_v22 }
 0xff7   :  { %v1323_v63 = vpop.xlane.xlu1 %1322 }
 0xff8   :  { %v1325_v0 = vmul.f32 0.03125, %v1323_v63  ;;  %v1320_v2 = vpop.xlane.xlu0 %1319 }
 0xff9   :  { %v1324_v4 = vmul.f32 0.03125, %v1320_v2 }
 0xffa   :  { %v1327_v5 = vsub.f32 %v1315_v59, %v1325_v0 }
 0xffb   :  { %v1326_v7 = vsub.f32 %v1314_v60, %v1324_v4  ;;  %v1879_v60 = vrot.slane %v1796_v54, %v3379_v14 }
 0xffc   :  { %v1329_v8 = vmul.f32 %v1327_v5, %v1327_v5 }
 0xffd   :  { %v1328_v9 = vmul.f32 %v1326_v7, %v1326_v7 }
 0xffe   :  { %v1333_v10 = vsel %vm147_vm4, %v1329_v8, 0.0 }
 0xfff   :  { %1334 = vadd.xlane.f32.xlu1 %v1333_v10  ;;  %v1330_v11 = vsel %vm147_vm4, %v1328_v9, 0.0 }
0x1000   :  { %1331 = vadd.xlane.f32.xlu0 %v1330_v11 }
0x108c   :  { %v1335_v20 = vpop.xlane.xlu1 %1334 }
0x108d   :  { %v1337_v21 = vmul.f32 0.03125, %v1335_v20  ;;  %v1332_v23 = vpop.xlane.xlu0 %1331 }
0x108e   :  { %v1336_v24 = vmul.f32 0.03125, %v1332_v23 }
0x108f   :  { %v1339_v25 = vadd.f32 1e-12, %v1337_v21 }
0x1090   :  { %v1338_v26 = vadd.f32 1e-12, %v1336_v24 }
0x1091   :  { %3207 = vrsqrt.f32 %v1339_v25 }
0x1092   :  { %3209 = vrsqrt.f32 %v1338_v26 }
0x109b   :  { %v3208_v27 = vpop.eup %3207 }
0x109c   :  { %v3210_v29 = vpop.eup %3209  ;;  %v1343_v6 = vmul.f32 %v3208_v27, %v1327_v5 }
0x109d   :  { %v1342_v30 = vmul.f32 %v3210_v29, %v1326_v7 }
0x109e   :  { %v1349_v32 = vmul.f32 %v2685_v28, %v1343_v6 }
0x109f   :  { %v1348_v33 = vmul.f32 %v2685_v28, %v1342_v30 }
0x10a0   :  { %v3460_v35 = vadd.f32 %v2686_v31, %v1349_v32 }
0x10a1   :  { %v3458_v34 = vadd.f32 %v2686_v31, %v1348_v33 }
0x10a3   :  { %2957 = vmatprep.mubr.msk.f32.mxu0 %vm147_vm4, %v3458_v34 }
0x10a4   :  { %2958 = vmatmul.mubr.msk.f32.vlgmr.msra.gmra.mrb[10].mxu0 %vm147_vm4, %v3460_v35 }
0x10a5   :  { %2962 = vmatprep.mubr.msk.f32.mxu0 %vm3292_vm5, %v3291_v22 }
0x1177   :  { %v2959_v37 = vpop.f32.mrb[10].mxu0 }
0x1178   :  { %v1437_v38 = vpop.f32.mrb[11].mxu0  ;;  %v3474_v40 = vadd.f32 %v2959_v37, %v2687_v36 }
0x1179   :  { %v3468_v39 = vadd.f32 %v2687_v36, %v1437_v38 }
0x117b   :  { %1624 = vrot.lane.b32.xlu1 %v3468_v39, %s3296_s6  ;;  %1450 = vrot.lane.b32.xlu0 %v3468_v39, %s3294_s2 }
0x117f   :  { %1622 = vrot.lane.b32.xlu1 %v3468_v39, %s3295_s5  ;;  %1798 = vrot.lane.b32.xlu0 %v3474_v40, %s3294_s2 }
0x1183   :  { %1972 = vrot.lane.b32.xlu1 %v3474_v40, %s3296_s6  ;;  %1970 = vrot.lane.b32.xlu0 %v3474_v40, %s3295_s5 }
0x11ed   :  { %v1625_v41 = vpop.permute.xlu1 %1624  ;;  %v1451_v42 = vpop.permute.xlu0 %1450 }
0x11ee   :  { %2961 = vmatpush3.xpose.msk.msra.mxu0 %vm283_vm6, %v1451_v42  ;;  %2971 = vmatpush3.xpose.msk.msra.mxu1 %vm283_vm6, %v1625_v41 }
0x11ef   :  { %2980 = vmatprep.subr.mxu1 %v3291_v22  ;;  %2965 = vmatprep.subr.mxu0 %v3291_v22 }
0x11f1   :  { %v1623_v43 = vpop.permute.xlu1 %1622  ;;  %2963 = vmatmul.mubr.msk.f32.vlgmr.msra.gmra.mrb[12].mxu0 %vm283_vm6, %v3468_v39  ;;  %v1799_v44 = vpop.permute.xlu0 %1798 }
0x11f2   :  { %2973 = vmatmul.mubr.msk.f32.vlgmr.msra.gmra.mrb[16].mxu1 %vm283_vm6, %v1623_v43  ;;  %2967 = vmatprep.mubr.msk.f32.mxu0 %vm3292_vm5, %v3291_v22 }
0x11f3   :  { %2981 = vmatpush3.xpose.msk.msra.mxu1 %vm283_vm6, %v1799_v44  ;;  %2982 = vmatprep.mubr.msk.f32.mxu1 %vm3292_vm5, %v3291_v22 }
0x11f4   :  { %2990 = vmatprep.subr.mxu1 %v3291_v22 }
0x11f5   :  { %v1973_v45 = vpop.permute.xlu1 %1972  ;;  %v1971_v46 = vpop.permute.xlu0 %1970 }
0x11f6   :  { %2983 = vmatmul.mubr.msk.f32.vlgmr.msra.gmra.mrb[18].mxu1 %vm283_vm6, %v3474_v40 }
0x11f7   :  { %2991 = vmatpush3.xpose.msk.msra.mxu1 %vm283_vm6, %v1973_v45  ;;  %2992 = vmatprep.mubr.msk.f32.mxu1 %vm3292_vm5, %v3291_v22 }
0x11fa   :  { %2993 = vmatmul.mubr.msk.f32.vlgmr.msra.gmra.mrb[20].mxu1 %vm283_vm6, %v1971_v46 }
0x12c4   :  { %v1522_v53 = vpop.f32.mrb[12].mxu0 }
0x12c5   :  { %v1526_v55 = vmul.f32 0.25, %v1522_v53  ;;  %v2964_v56 = vpop.f32.mrb[13].mxu0  ;;  %v1696_v57 = vpop.f32.mrb[16].mxu1 }
0x12c6   :  { %v1700_v58 = vmul.f32 0.25, %v1696_v57  ;;  %v2974_v3 = vpop.f32.mrb[17].mxu1  ;;  %v2145_v56 = vld [vmem:[#allocation3 + $0x1a0] sm:$0xff] }
0x12c7   :  { %v1533_v1 = vadd.f32 %v1531_v52, %v1526_v55  ;;  %v2144_v55 = vld [vmem:[#allocation3 + $0x198] sm:$0xff]  ;;  %v2147_v3 = vld [vmem:[#allocation3 + $0x1b0] sm:$0xff] }
0x12c8   :  { %v1701_v59 = vadd.f32 %v1700_v58, %v1531_v52  ;;  %v3124_v57 = vpack.c.bf16 %v2145_v56, %v2144_v55  ;;  %v2146_v58 = vld [vmem:[#allocation3 + $0x1a8] sm:$0xff]  ;;  %v2389_v55 = vld [vmem:[#allocation3 + $0x210] sm:$0xff] }
0x12c9   :  { %v1870_v61 = vpop.f32.mrb[18].mxu1  ;;  %v1534_v62 = vsel %vm366_vm7, %v1533_v1, -inf }
0x12ca   :  { %v1874_v63 = vmul.f32 0.25, %v1870_v61  ;;  %1535 = vmax.xlane.f32.xlu1 %v1534_v62  ;;  %v2984_v0 = vpop.f32.mrb[19].mxu1  ;;  %v1702_v2 = vsel %vm366_vm7, %v1701_v59, -inf  ;;  %3125 = vmatprep.subr.bf16.mxu1 %v3124_v57 }
0x12cb   :  { %1703 = vmax.xlane.f32.xlu0 %v1702_v2  ;;  %3127 = vmatpush3.bf16.msra.mxu1 %v3124_v57  ;;  %v2390_v57 = vld [vmem:[#allocation3 + $0x218] sm:$0xff] }
0x12cc   :  { %v1881_v4 = vadd.f32 %v1879_v60, %v1874_v63 }
0x12cd   :  { %v2044_v5 = vpop.f32.mrb[20].mxu1 }
0x12ce   :  { %v2048_v7 = vmul.f32 0.25, %v2044_v5  ;;  %v2994_v8 = vpop.f32.mrb[21].mxu1  ;;  %v1882_v9 = vsel %vm366_vm7, %v1881_v4, -inf  ;;  %v2703_v5 = vld [vmem:[#allocation3 + $0x1b8] ss:$0 sm:$0xff] }
0x12cf   :  { %1883 = vmax.xlane.f32.xlu0 %v1882_v9 }
0x12d0   :  { %v2049_v10 = vadd.f32 %v2048_v7, %v1879_v60 }
0x12d2   :  { %v2050_v11 = vsel %vm366_vm7, %v2049_v10, -inf }
0x12d3   :  { %2051 = vmax.xlane.f32.xlu1 %v2050_v11 }
0x12e4   :  { %1713 = vrot.lane.b32.xlu1 %v3468_v39, %s3297_s7 }
0x1357   :  { %v1536_v14 = vpop.xlane.xlu1 %1535 }
0x1358   :  { %v1537_v13 = vsub.f32 %v1533_v1, %v1536_v14  ;;  %v1704_v15 = vpop.xlane.xlu0 %1703  ;;  %v3128_v1 = vpack.c.bf16 %v2147_v3, %v2146_v58  ;;  %v2391_v58 = vld [vmem:[#allocation3 + $0x220] sm:$0xff] }
0x1359   :  { %v1705_v16 = vsub.f32 %v1701_v59, %v1704_v15  ;;  %v3152_v3 = vpack.c.bf16 %v2391_v58, %v2390_v57  ;;  %v2715_v57 = vld [vmem:[#allocation3 + $0x22c] ss:$0 sm:$0xff] }
0x135a   :  { %v1538_v17 = vmul.f32 1.442695, %v1537_v13  ;;  %3129 = vmatprep.subr.bf16.mxu1 %v3128_v1 }
0x135b   :  { %v1706_v18 = vmul.f32 1.442695, %v1705_v16  ;;  %3131 = vmatpush3.bf16.msra.mxu1 %v3128_v1 }
0x135c   :  { %3211 = vpow2.f32 %v1538_v17  ;;  %v1884_v29 = vpop.xlane.xlu0 %1883 }
0x135d   :  { %3213 = vpow2.f32 %v1706_v18  ;;  %v1885_v6 = vsub.f32 %v1881_v4, %v1884_v29  ;;  %v2279_v29 = vld [vmem:[#allocation3 + $0x1d8] sm:$0xff] }
0x135f   :  { %v1886_v30 = vmul.f32 1.442695, %v1885_v6 }
0x1360   :  { %v2052_v19 = vpop.xlane.xlu1 %2051 }
0x1361   :  { %v2053_v20 = vsub.f32 %v2049_v10, %v2052_v19 }
0x1363   :  { %v2054_v21 = vmul.f32 1.442695, %v2053_v20 }
0x1364   :  { %v1714_v33 = vpop.permute.xlu1 %1713 }
0x1365   :  { %3215 = vpow2.f32 %v2054_v21 }
0x1366   :  { %v3212_v23 = vpop.eup %3211  ;;  %3217 = vpow2.f32 %v1886_v30 }
0x1367   :  { %v3214_v24 = vpop.eup %3213  ;;  %v1540_v25 = vsel %vm366_vm7, %v3212_v23, 0.0 }
0x1368   :  { %1541 = vadd.xlane.f32.xlu0 %v1540_v25  ;;  %v1708_v26 = vsel %vm366_vm7, %v3214_v24, 0.0 }
0x1369   :  { %1709 = vadd.xlane.f32.xlu1 %v1708_v26  ;;  %v2277_v26 = vld [vmem:[#allocation3 + $0x1c8] sm:$0xff] }
0x136f   :  { %v3216_v27 = vpop.eup %3215 }
0x1370   :  { %v2056_v28 = vsel %vm366_vm7, %v3216_v27, 0.0  ;;  %v3218_v31 = vpop.eup %3217 }
0x1371   :  { %2057 = vadd.xlane.f32.xlu1 %v2056_v28  ;;  %v1888_v32 = vsel %vm366_vm7, %v3218_v31, 0.0  ;;  %v2278_v28 = vld [vmem:[#allocation3 + $0x1d0] sm:$0xff] }
0x1372   :  { %v3136_v6 = vpack.c.bf16 %v2279_v29, %v2278_v28 }
0x137e   :  { %1545 = vrot.lane.b32.xlu0 %v3468_v39, %s3293_s0 }
0x1382   :  { %1893 = vrot.lane.b32.xlu1 %v3474_v40, %s3293_s0 }
0x139d   :  { %1889 = vadd.xlane.f32.xlu0 %v1888_v32 }
0x13b3   :  { %2061 = vrot.lane.b32.xlu0 %v3474_v40, %s3297_s7 }
0x13f5   :  { %v1542_v36 = vpop.xlane.xlu0 %1541 }
0x13f6   :  { %3219 = vrcp.f32 %v1542_v36  ;;  %v1710_v37 = vpop.xlane.xlu1 %1709 }
0x13f7   :  { %3221 = vrcp.f32 %v1710_v37 }
0x13f9   :  { %v1546_v38 = vpop.permute.xlu0 %1545 }
0x13fa   :  { %2966 = vmatpush3.msra.mxu0 %v1546_v38 }
0x13fb   :  { %2975 = vmatprep.subr.mxu0 %v3291_v22 }
0x13fe   :  { %v2058_v42 = vpop.xlane.xlu1 %2057 }
0x1400   :  { %v3220_v39 = vpop.eup %3219 }
0x1401   :  { %v1544_v41 = vmul.f32 %v3220_v39, %v3212_v23  ;;  %v3222_v43 = vpop.eup %3221  ;;  %v2706_v39 = vld [vmem:[#allocation3 + $0x229] ss:$0 sm:$0xff] }
0x1402   :  { %v1712_v40 = vmul.f32 %v3222_v43, %v3214_v24  ;;  %v1894_v44 = vpop.permute.xlu1 %1893 }
0x1403   :  { %2968 = vmatmul.mubr.msk.f32.vlgmr.msra.gmra.mrb[14].mxu0 %vm366_vm7, %v1544_v41 }
0x1404   :  { %2976 = vmatpush3.msra.mxu0 %v1714_v33  ;;  %2977 = vmatprep.mubr.msk.f32.mxu0 %vm3292_vm5, %v3291_v22 }
0x1405   :  { %2985 = vmatprep.subr.mxu0 %v3291_v22 }
0x1407   :  { %2978 = vmatmul.mubr.msk.f32.vlgmr.msra.gmra.mrb[16].mxu0 %vm366_vm7, %v1712_v40  ;;  %v2707_v40 = vld [vmem:[#allocation3 + $0x22a] ss:$0 sm:$0xff] }
0x1408   :  { %2986 = vmatpush3.msra.mxu0 %v1894_v44  ;;  %2987 = vmatprep.mubr.msk.f32.mxu0 %vm3292_vm5, %v3291_v22 }
0x1409   :  { %2995 = vmatprep.subr.mxu0 %v3291_v22 }
0x142a   :  { %v1890_v45 = vpop.xlane.xlu0 %1889 }
0x142b   :  { %3223 = vrcp.f32 %v1890_v45 }
0x142c   :  { %3225 = vrcp.f32 %v2058_v42 }
0x142e   :  { %v2062_v49 = vpop.permute.xlu0 %2061 }
0x1435   :  { %v3224_v46 = vpop.eup %3223 }
0x1436   :  { %v1892_v47 = vmul.f32 %v3224_v46, %v3218_v31  ;;  %v3226_v48 = vpop.eup %3225 }
0x1437   :  { %v2060_v50 = vmul.f32 %v3226_v48, %v3216_v27  ;;  %v2384_v48 = vld [vmem:[#allocation3 + $0x1e8] sm:$0xff] }
0x1438   :  { %2988 = vmatmul.mubr.msk.f32.vlgmr.msra.gmra.mrb[18].mxu0 %vm366_vm7, %v1892_v47 }
0x1439   :  { %2996 = vmatpush3.msra.mxu0 %v2062_v49  ;;  %2997 = vmatprep.mubr.msk.f32.mxu0 %vm3292_vm5, %v3291_v22  ;;  %v2385_v49 = vld [vmem:[#allocation3 + $0x1f0] sm:$0xff] }
0x143c   :  { %2998 = vmatmul.mubr.msk.f32.vlgmr.msra.gmra.mrb[20].mxu0 %vm366_vm7, %v2060_v50  ;;  %v3140_v50 = vpack.c.bf16 %v2385_v49, %v2384_v48 }
0x143e   :  { %3141 = vmatprep.subr.bf16.mxu1 %v3140_v50 }
0x14d6   :  { %v1617_v51 = vpop.f32.mrb[14].mxu0 }
0x14d7   :  { %1621 = vst.msk [vmem:[#allocation2] sm:$0xff] %vm283_vm6, %v1617_v51  ;;  %v2969_v52 = vpop.f32.mrb[15].mxu0  ;;  %v2386_v51 = vld [vmem:[#allocation3 + $0x1f8] sm:$0xff] }
0x14d8   :  { %v2387_v52 = vld [vmem:[#allocation3 + $0x200] sm:$0xff] }
0x14da   :  { %v1785_v53 = vpop.f32.mrb[16].mxu0 }
0x14db   :  { %1790 = vrot.lane.b32.xlu1 %v1785_v53, %s3298_s10  ;;  %v2979_v54 = vpop.f32.mrb[17].mxu0  ;;  %v3144_v53 = vpack.c.bf16 %v2387_v52, %v2386_v51 }
0x14dc   :  { %v2388_v54 = vld [vmem:[#allocation3 + $0x208] sm:$0xff] }
0x14dd   :  { %v3148_v56 = vpack.c.bf16 %v2389_v55, %v2388_v54 }
0x150b   :  { %v1965_v59 = vpop.f32.mrb[18].mxu0 }
0x150c   :  { %1969 = vst.msk [vmem:[#allocation2 + $0x8] sm:$0xff] %vm283_vm6, %v1965_v59  ;;  %v2989_v60 = vpop.f32.mrb[19].mxu0 }
0x150f   :  { %v2133_v61 = vpop.f32.mrb[20].mxu0 }
0x1510   :  { %2138 = vrot.lane.b32.xlu0 %v2133_v61, %s3298_s10  ;;  %v2999_v62 = vpop.f32.mrb[21].mxu0 }
0x154d   :  { %v1791_v63 = vpop.permute.xlu1 %1790 }
0x154e   :  { %1793 = vst.msk [vmem:[#allocation2] sm:$0xff] %vm626_vm8, %v1791_v63 }
0x1555   :  { %v2142_v0 = vld [vmem:[#allocation2] sm:$0xff] }
0x1556   :  { %3008 = vmatprep.mubr.msk.f32.mxu1 %vm147_vm4, %v2142_v0 }
0x1582   :  { %v2139_v2 = vpop.permute.xlu0 %2138 }
0x1583   :  { %2141 = vst.msk [vmem:[#allocation2 + $0x8] sm:$0xff] %vm626_vm8, %v2139_v2 }
0x158a   :  { %v2143_v4 = vld [vmem:[#allocation2 + $0x8] sm:$0xff] }
0x158b   :  { %3009 = vmatmul.mubr.msk.f32.vlgmr.msra.gmra.mrb[22].mxu1 %vm147_vm4, %v2143_v4 }
0x158c   :  { %3143 = vmatpush3.bf16.msra.mxu1 %v3140_v50 }
0x158d   :  { %3145 = vmatprep.subr.bf16.mxu1 %v3144_v53 }
0x1590   :  { %3147 = vmatpush3.bf16.msra.mxu1 %v3144_v53  ;;  %v2714_v53 = vld [vmem:[#allocation3 + $0x22b] ss:$0 sm:$0xff] }
0x1591   :  { %3149 = vmatprep.subr.bf16.mxu1 %v3148_v56 }
0x1594   :  { %3151 = vmatpush3.bf16.msra.mxu1 %v3148_v56 }
0x1595   :  { %3153 = vmatprep.subr.bf16.mxu1 %v3152_v3 }
0x1598   :  { %3155 = vmatpush3.bf16.msra.mxu1 %v3152_v3 }
0x165e   :  { %v3010_v7 = vpop.f32.mrb[22].mxu1 }
0x165f   :  { %v2231_v8 = vadd.f32 %v3010_v7, %v2703_v5  ;;  %v2225_v9 = vpop.f32.mrb[23].mxu1 }
0x1660   :  { %v2226_v10 = vadd.f32 %v2703_v5, %v2225_v9 }
0x1661   :  { %v2235_v11 = vadd.f32 %v2231_v8, %v3460_v35 }
0x1662   :  { %v2234_v14 = vadd.f32 %v2226_v10, %v3458_v34  ;;  %v2276_v34 = vld [vmem:[#allocation3 + $0x1c0] sm:$0xff] }
0x1663   :  { %v2241_v13 = vsel %vm147_vm4, %v2235_v11, 0.0  ;;  %v3132_v27 = vpack.c.bf16 %v2277_v26, %v2276_v34 }
0x1664   :  { %2242 = vadd.xlane.f32.xlu0 %v2241_v13  ;;  %v2238_v15 = vsel %vm147_vm4, %v2234_v14, 0.0 }
0x1665   :  { %2239 = vadd.xlane.f32.xlu1 %v2238_v15  ;;  %3133 = vmatprep.subr.bf16.mxu0 %v3132_v27 }
0x1666   :  { %3135 = vmatpush3.bf16.msra.mxu0 %v3132_v27 }
0x1667   :  { %3137 = vmatprep.subr.bf16.mxu0 %v3136_v6 }
0x166a   :  { %3139 = vmatpush3.bf16.msra.mxu0 %v3136_v6 }
0x16f1   :  { %v2243_v16 = vpop.xlane.xlu0 %2242 }
0x16f2   :  { %v2245_v17 = vmul.f32 0.03125, %v2243_v16  ;;  %v2240_v18 = vpop.xlane.xlu1 %2239 }
0x16f3   :  { %v2244_v19 = vmul.f32 0.03125, %v2240_v18 }
0x16f4   :  { %v2247_v20 = vsub.f32 %v2235_v11, %v2245_v17 }
0x16f5   :  { %v2246_v21 = vsub.f32 %v2234_v14, %v2244_v19 }
0x16f6   :  { %v2249_v23 = vmul.f32 %v2247_v20, %v2247_v20 }
0x16f7   :  { %v2248_v24 = vmul.f32 %v2246_v21, %v2246_v21 }
0x16f8   :  { %v2253_v25 = vsel %vm147_vm4, %v2249_v23, 0.0 }
0x16f9   :  { %2254 = vadd.xlane.f32.xlu1 %v2253_v25  ;;  %v2250_v35 = vsel %vm147_vm4, %v2248_v24, 0.0 }
0x16fa   :  { %2251 = vadd.xlane.f32.xlu0 %v2250_v35 }
0x1786   :  { %v2255_v30 = vpop.xlane.xlu1 %2254 }
0x1787   :  { %v2257_v31 = vmul.f32 0.03125, %v2255_v30  ;;  %v2252_v32 = vpop.xlane.xlu0 %2251 }
0x1788   :  { %v2256_v33 = vmul.f32 0.03125, %v2252_v32 }
0x1789   :  { %v2259_v36 = vadd.f32 1e-12, %v2257_v31 }
0x178a   :  { %v2258_v37 = vadd.f32 1e-12, %v2256_v33 }
0x178b   :  { %3227 = vrsqrt.f32 %v2259_v36 }
0x178c   :  { %3229 = vrsqrt.f32 %v2258_v37 }
0x1795   :  { %v3228_v38 = vpop.eup %3227 }
0x1796   :  { %v3230_v41 = vpop.eup %3229  ;;  %v2263_v42 = vmul.f32 %v3228_v38, %v2247_v20  ;;  %v2711_v20 = vld [vmem:[#allocation3 + $0x228] ss:$0 sm:$0xff] }
0x1797   :  { %v2262_v43 = vmul.f32 %v3230_v41, %v2246_v21  ;;  %v2526_v41 = vld [vmem:[#allocation3 + $0x10] sm:$0xff] }
0x1798   :  { %v2269_v44 = vmul.f32 %v2706_v39, %v2263_v42 }
0x1799   :  { %v2268_v45 = vmul.f32 %v2706_v39, %v2262_v43  ;;  %v2525_v39 = vld [vmem:[#allocation3 + $0x8] sm:$0xff]  ;;  %v2527_v43 = vld [vmem:[#allocation3 + $0x18] sm:$0xff] }
0x179a   :  { %v2275_v47 = vadd.f32 %v2707_v40, %v2269_v44  ;;  %v3157_v42 = vpack.c.bf16 %v2526_v41, %v2525_v39  ;;  %v3299_v44 = vmov 0.0|0.0  }
0x179b   :  { %v2274_v46 = vadd.f32 %v2707_v40, %v2268_v45  ;;  %v2528_v40 = vld [vmem:[#allocation3 + $0x20] sm:$0xff]  ;;  %3156 = vmatprep.subr.bf16.mxu0 %v3299_v44 }
0x179c   :  { %v3160_v45 = vpack.c.bf16 %v2528_v40, %v2527_v43 }
0x179d   :  { %3019 = vmatprep.mubr.msk.f32.mxu0 %vm147_vm4, %v2274_v46 }
0x179e   :  { %3020 = vmatmul.mubr.msk.f32.vlgmr.msra.gmra.mrb[22].mxu0 %vm147_vm4, %v2275_v47 }
0x179f   :  { %3049 = vmatprep.mubr.msk.f32.mxu0 %vm3292_vm5, %v3291_v22  ;;  %v2708_v22 = vld [vmem:[#allocation3 + $0x1e0] ss:$0 sm:$0xff]  ;;  %3158 = vmatpush3.bf16.msra.mxu0 %v3157_v42 }
0x17a0   :  { %3159 = vmatprep.subr.bf16.mxu0 %v3299_v44 }
0x17a3   :  { %3161 = vmatpush3.bf16.msra.mxu0 %v3160_v45 }
0x1871   :  { %v3021_v1 = vpop.f32.mrb[22].mxu0 }
0x1872   :  { %v2363_v59 = vadd.f32 %v3021_v1, %v2708_v22  ;;  %v2357_v60 = vpop.f32.mrb[23].mxu0 }
0x1873   :  { %v2358_v61 = vadd.f32 %v2708_v22, %v2357_v60 }
0x1874   :  { %v2369_v62 = vmul.f32 0.044715, %v2363_v59  ;;  %v2367_v17 = vmul.f32 0.5, %v2363_v59 }
0x1875   :  { %v2368_v63 = vmul.f32 0.044715, %v2358_v61  ;;  %v2366_v15 = vmul.f32 0.5, %v2358_v61 }
0x1876   :  { %v2371_v0 = vmul.f32 %v2369_v62, %v2363_v59 }
0x1877   :  { %v2370_v2 = vmul.f32 %v2368_v63, %v2358_v61 }
0x1878   :  { %v2373_v4 = vmul.f32 %v2371_v0, %v2363_v59  ;;  %v2716_v0 = vld [vmem:[#allocation3 + $0x2] ss:$0 sm:$0xff] }
0x1879   :  { %v2372_v5 = vmul.f32 %v2370_v2, %v2358_v61 }
0x187a   :  { %v2375_v7 = vadd.f32 %v2373_v4, %v2363_v59 }
0x187b   :  { %v2374_v8 = vadd.f32 %v2372_v5, %v2358_v61  ;;  %v3300_v61 = vmov 1966171168  }
0x187c   :  { %v2377_v9 = vmul.f32 0.7978846, %v2375_v7  ;;  %v2609_v62 = vunpack.c.l.s4 %v3300_v61 }
0x187d   :  { %v2376_v10 = vmul.f32 0.7978846, %v2374_v8 }
0x187e   :  { %3231 = vtanh.f32 %v2377_v9  ;;  %v2610_v63 = vunpack.c.0.s8 %v2609_v62 }
0x187f   :  { %3233 = vtanh.f32 %v2376_v10 }
0x1880   :  { %v2613_v2 = vsub.s32 %v2610_v63, %v3376_v12 }
0x1888   :  { %v3232_v11 = vpop.eup %3231 }
0x1889   :  { %v3234_v14 = vpop.eup %3233  ;;  %v2381_v13 = vadd.f32 1.0, %v3232_v11 }
0x188a   :  { %v2380_v16 = vadd.f32 1.0, %v3234_v14 }
0x188b   :  { %v2383_v19 = vmul.f32 %v2381_v13, %v2367_v17 }
0x188c   :  { %v2382_v18 = vmul.f32 %v2380_v16, %v2366_v15 }
0x188e   :  { %3038 = vmatprep.mubr.msk.f32.mxu1 %vm1232_vm9, %v2382_v18 }
0x188f   :  { %3039 = vmatmul.mubr.msk.f32.vlgmr.msra.gmra.mrb[24].mxu1 %vm1232_vm9, %v2383_v19 }
0x1962   :  { %v3040_v21 = vpop.f32.mrb[24].mxu1 }
0x1963   :  { %v2475_v23 = vadd.f32 %v3040_v21, %v2711_v20  ;;  %v2469_v24 = vpop.f32.mrb[25].mxu1 }
0x1964   :  { %v2470_v25 = vadd.f32 %v2711_v20, %v2469_v24 }
0x1965   :  { %v2479_v35 = vadd.f32 %v2475_v23, %v2275_v47 }
0x1966   :  { %v2478_v34 = vadd.f32 %v2470_v25, %v2274_v46 }
0x1967   :  { %v2485_v26 = vsel %vm147_vm4, %v2479_v35, 0.0 }
0x1968   :  { %2486 = vadd.xlane.f32.xlu0 %v2485_v26  ;;  %v2482_v27 = vsel %vm147_vm4, %v2478_v34, 0.0 }
0x1969   :  { %2483 = vadd.xlane.f32.xlu1 %v2482_v27 }
0x19f5   :  { %v2487_v28 = vpop.xlane.xlu0 %2486 }
0x19f6   :  { %v2489_v29 = vmul.f32 0.03125, %v2487_v28  ;;  %v2484_v6 = vpop.xlane.xlu1 %2483 }
0x19f7   :  { %v2488_v30 = vmul.f32 0.03125, %v2484_v6 }
0x19f8   :  { %v2491_v31 = vsub.f32 %v2479_v35, %v2489_v29 }
0x19f9   :  { %v2490_v32 = vsub.f32 %v2478_v34, %v2488_v30 }
0x19fa   :  { %v2493_v33 = vmul.f32 %v2491_v31, %v2491_v31 }
0x19fb   :  { %v2492_v36 = vmul.f32 %v2490_v32, %v2490_v32 }
0x19fc   :  { %v2497_v37 = vsel %vm147_vm4, %v2493_v33, 0.0 }
0x19fd   :  { %2498 = vadd.xlane.f32.xlu0 %v2497_v37  ;;  %v2494_v38 = vsel %vm147_vm4, %v2492_v36, 0.0 }
0x19fe   :  { %2495 = vadd.xlane.f32.xlu1 %v2494_v38 }
0x1a8a   :  { %v2499_v46 = vpop.xlane.xlu0 %2498 }
0x1a8b   :  { %v2501_v47 = vmul.f32 0.03125, %v2499_v46  ;;  %v2496_v48 = vpop.xlane.xlu1 %2495 }
0x1a8c   :  { %v2500_v49 = vmul.f32 0.03125, %v2496_v48 }
0x1a8d   :  { %v2503_v50 = vadd.f32 1e-12, %v2501_v47 }
0x1a8e   :  { %v2502_v51 = vadd.f32 1e-12, %v2500_v49 }
0x1a8f   :  { %3235 = vrsqrt.f32 %v2503_v50 }
0x1a90   :  { %3237 = vrsqrt.f32 %v2502_v51 }
0x1a99   :  { %v3236_v52 = vpop.eup %3235 }
0x1a9a   :  { %v3238_v54 = vpop.eup %3237  ;;  %v2507_v55 = vmul.f32 %v3236_v52, %v2491_v31 }
0x1a9b   :  { %v2506_v56 = vmul.f32 %v3238_v54, %v2490_v32 }
0x1a9c   :  { %v2513_v58 = vmul.f32 %v2714_v53, %v2507_v55 }
0x1a9d   :  { %v2512_v3 = vmul.f32 %v2714_v53, %v2506_v56 }
0x1a9e   :  { %v2519_v22 = vadd.f32 %v2715_v57, %v2513_v58 }
0x1a9f   :  { %v2518_v1 = vadd.f32 %v2715_v57, %v2512_v3 }
0x1aa0   :  { %v2521_v59 = vrot.slane %v2519_v22, 7 }
0x1aa2   :  { %v2524_v60 = vsel %vm2523_vm10, %v2518_v1, %v2521_v59 }
0x1aa3   :  { %3050 = vmatmul.mubr.msk.f32.vlgmr.msra.gmra.mrb[24].mxu0 %vm147_vm4, %v2524_v60 }
0x1b76   :  { %v2603_v4 = vpop.f32.mrb[24].mxu0 }
0x1b77   :  { %v2604_v5 = vadd.f32 %v2716_v0, %v2603_v4  ;;  %v3051_v7 = vpop.f32.mrb[25].mxu0 }
0x1b79   :  { %v2614_v8 = vrot.slane %v2604_v5, %v2613_v2 }
0x1b7b   :  { %v2615_v9 = vcombine.high %v2614_v8, %v2614_v8  ;;  %2718 = vst.sshfl [vmem:[#allocation6] sm:$0x1 pattern:$0x73625140] %v2614_v8 }
0x1b7d   :  { %2719 = vst.sshfl [vmem:[#allocation6 + $0x1] sm:$0x1 pattern:$0x73625140] %v2615_v9 }
0x1b7e   :  { %3272 = shalt.err (!%p3269_p12)
}
0x1b7f   :  { %s3273_s19 = scalar_lea.hbm %s3583_s3, 32 }
0x1b80   :  { %p3274_p13 = scmp.ne.s32.totalorder %s3583_s3, %s3273_s19  ;;  %p3277_p0 = scmp.lt.u32.totalorder %s3273_s19, %s3583_s3 }
0x1b82   :  { %p3279_p1 = pnand %p3277_p0, %p3274_p13 }
0x1b84   :  { %3282 = shalt.err (!%p3279_p1)
}
0x1b85   :  { %s3302_s24 = smov 1  }
0x1b86   :  { %2645 = dma.vmem_to_hbm [thread:$0]  %s2640_s15, 32, %s3583_s3, [#allocation5], %s3298_s10, %s3298_s10, %s3302_s24  }
0x1b87   :  { %3285 = dma.done.wait [#allocation5], 32  }
0x1b88   :  { %3286 = vsyncadd [#allocation5], 4294967264 }
0x1b89   :  { %2649 = vsyncpa [#allocation4], 1 }
0x1b8a   :  { %2650 = vsyncpa [#allocation5], 1 }

</bundles_post_ra>
